<compile_context>
chip_gen: v7x
topology: tpu7x:2x2x1
jax: 0.10.0
libtpu: 0.0.40
codegen_flags: <defaults>
</compile_context>

<pallas_src>
import functools

import jax
import jax.numpy as jnp
from jax import lax
from jax.experimental import pallas as pl
from jax.experimental.pallas import tpu as pltpu

ALPHA = 0.25
GAMMA = 2.0          # fixed at 2.0 -> modulator is an explicit square below
_PAD_LOGIT = -100.0  # with target=0 this yields an exactly-zero loss element


def _focal_loss_kernel(x_ref, t_ref, partial_ref, *, row_tiles, approx):
    """One grid step: focal loss over a (row_tiles*8, tn) block, folded onto a
    single (8, tn) f32 accumulator (VPU/EUP only, no cross-lane reduce)."""

    def tile_loss(r):
        off = r * 8 if isinstance(r, int) else pl.multiple_of(r * 8, 8)
        x = x_ref[pl.ds(off, 8), :].astype(jnp.float32)
        t = t_ref[pl.ds(off, 8), :].astype(jnp.float32)

        e = jnp.exp(-jnp.abs(x))                 # shared by BCE and sigmoid
        one_plus_e = 1.0 + e
        # Numerically stable BCE-with-logits; e in (0, 1] so log(1+e) is safe.
        bce = jnp.maximum(x, 0.0) - x * t + jnp.log(one_plus_e)
        if approx:
            d = pl.reciprocal(one_plus_e, approx=True)   # EUP vrcp (spare slot)
        else:
            d = 1.0 / one_plus_e
        p = jnp.where(x >= 0.0, d, e * d)        # sigmoid(x)

        m = p + t - 2.0 * p * t                  # == 1 - pt   (3 VALU ops)
        alpha_f = (2.0 * ALPHA - 1.0) * t + (1.0 - ALPHA)    # single FMA
        return alpha_f * (m * m) * bce           # gamma == 2 -> square

    acc = tile_loss(0)                           # init from first tile (no zeros+add)
    if row_tiles > 1:
        acc = lax.fori_loop(1, row_tiles, lambda r, a: a + tile_loss(r), acc,
                            unroll=min(8, row_tiles - 1))
    partial_ref[...] = acc[None]                 # lane-dense (1, 8, tn) block


def _round_up(x, m):
    return -(-x // m) * m


def _choose_tm(rows, block_rows, min_blocks, min_rows_per_block=64):
    """Rows per block: as large as `block_rows`, but shrunk so big problems
    expose >= `min_blocks` parallel grid steps (never below
    `min_rows_per_block` rows unless the whole problem is smaller)."""
    tm = min(block_rows, rows)
    want = min(min_blocks, max(1, rows // min_rows_per_block))
    if want > 1:
        tm = min(tm, max(min_rows_per_block, (rows // want) // 8 * 8))
    return max(8, (tm // 8) * 8)


def focal_loss(logits, targets, *, block_rows=512, lane_width=512,
               min_blocks=8, approx=True):
    """Mean-reduced binary focal loss (alpha=0.25, gamma=2.0).

    Shape-agnostic (any matching shapes).  logits/targets may be f32 or bf16
    (targets may also be an integer dtype holding hard {0, 1} labels); the
    kernel upcasts to f32, so narrow inputs just reduce HBM traffic.
    """
    # TODO(synk): only the module's default reduction='mean' is implemented
    # ('sum' would just skip the divide; 'none' needs an elementwise-output kernel).
    assert logits.shape == targets.shape
    total = logits.size
    assert total > 0
    assert lane_width % 128 == 0, "lane_width must be a multiple of 128"

    tn = lane_width
    rows = _round_up(pl.cdiv(total, tn), 8)
    tm = _choose_tm(rows, block_rows, min_blocks)
    rows = _round_up(rows, tm)
    grid_m = rows // tm

    flat_x = logits.reshape(-1)
    flat_t = targets.reshape(-1)
    pad = rows * tn - total
    if pad:
        # Padded (x=-100, t=0) elements contribute exactly 0 to the loss sum,
        # so no in-kernel masking is needed; the mean divides by `total`.
        flat_x = jnp.concatenate(
            [flat_x, jnp.full((pad,), _PAD_LOGIT, flat_x.dtype)])
        flat_t = jnp.concatenate([flat_t, jnp.zeros((pad,), flat_t.dtype)])
    x2 = flat_x.reshape(rows, tn)
    t2 = flat_t.reshape(rows, tn)

    kernel = functools.partial(_focal_loss_kernel,
                               row_tiles=tm // 8, approx=approx)

    partials = pl.pallas_call(
        kernel,
        out_shape=jax.ShapeDtypeStruct((grid_m, 8, tn), jnp.float32),
        grid_spec=pltpu.PrefetchScalarGridSpec(
            num_scalar_prefetch=0,
            grid=(grid_m,),
            in_specs=[
                pl.BlockSpec((tm, tn), lambda i: (i, 0)),
                pl.BlockSpec((tm, tn), lambda i: (i, 0)),
            ],
            out_specs=pl.BlockSpec((1, 8, tn), lambda i: (i, 0, 0)),
        ),
        compiler_params=pltpu.CompilerParams(
            # Independent per-block partial sums -> fully parallel grid.
            dimension_semantics=("parallel",),
        ),
    )(x2, t2)

    # Tiny final reduce + mean in plain JAX; divide by the *true* count.
    return jnp.sum(partials) / jnp.float32(total)


def focal_loss_ref(logits, targets):
    """Pure-JAX reference mirroring the PyTorch forward exactly."""
    x = logits.astype(jnp.float32)
    t = targets.astype(jnp.float32)
    bce = jnp.maximum(x, 0.0) - x * t + jnp.log1p(jnp.exp(-jnp.abs(x)))
    p = jax.nn.sigmoid(x)
    pt = p * t + (1.0 - p) * (1.0 - t)
    focal = (ALPHA * t + (1.0 - ALPHA) * (1.0 - t)) * (1.0 - pt) ** GAMMA * bce
    return jnp.mean(focal)


if __name__ == "__main__":
    # FocalLoss has no learnable parameters (alpha/gamma are fixed scalars).
    key = jax.random.PRNGKey(0)
    k_x, k_t, k_x2, k_t2 = jax.random.split(key, 4)

    # Small, tile-aligned problem.
    M, N = 128, 256
    logits = jax.random.normal(k_x, (M, N), jnp.float32) * 2.0
    targets = jax.random.bernoulli(k_t, 0.1, (M, N)).astype(jnp.float32)
    ref = jax.block_until_ready(focal_loss_ref(logits, targets))

    # Default config (approx sigmoid reciprocal on the EUP).
    out = jax.block_until_ready(focal_loss(logits, targets))
    assert jnp.allclose(out, ref, rtol=5e-3, atol=1e-6), (out, ref)

    # Exact-reciprocal path at tight tolerance.
    out_exact = jax.block_until_ready(focal_loss(logits, targets, approx=False))
    assert jnp.allclose(out_exact, ref, rtol=1e-5, atol=1e-6), (out_exact, ref)

    # bf16 inputs (halved HBM traffic on v5e/v6e; kernel upcasts to f32).
    out_bf16 = jax.block_until_ready(
        focal_loss(logits.astype(jnp.bfloat16), targets.astype(jnp.bfloat16)))
    assert jnp.allclose(out_bf16, ref, rtol=2e-2, atol=1e-4), (out_bf16, ref)

    # Awkward (non 8x128-aligned) shape: exercises padding + a multi-step grid.
    M2, N2 = 523, 77
    logits2 = jax.random.normal(k_x2, (M2, N2), jnp.float32) * 2.0
    targets2 = jax.random.bernoulli(k_t2, 0.1, (M2, N2)).astype(jnp.float32)
    ref2 = jax.block_until_ready(focal_loss_ref(logits2, targets2))
    out2 = jax.block_until_ready(
        focal_loss(logits2, targets2, block_rows=16, lane_width=128))
    assert jnp.allclose(out2, ref2, rtol=5e-3, atol=1e-6), (out2, ref2)

    print("KERNEL_OK")
</pallas_src>

<mosaic_0001>
module attributes {stable_mosaic.version = 11 : i64} {
  func.func @_focal_loss_kernel(%arg0: i32, %arg1: memref<64x512xf32, #tpu.memory_space<vmem>>, %arg2: memref<64x512xf32, #tpu.memory_space<vmem>>, %arg3: memref<1x8x512xf32, #tpu.memory_space<vmem>>) attributes {dimension_semantics = [#tpu.dimension_semantics<parallel>], iteration_bounds = array<i64: 1>, scalar_prefetch = 0 : i64, scratch_operands = 0 : i64, tpu.core_type = #tpu.core_type<tc>, window_params = [{transform_indices = @transform_0, window_bounds = array<i64: 64, 512>}, {transform_indices = @transform_1, window_bounds = array<i64: 64, 512>}, {transform_indices = @transform_2, window_bounds = array<i64: 1, 8, 512>}]} {
    %c0 = arith.constant 0 : index
    %c0_0 = arith.constant 0 : index
    %0 = vector.load %arg1[%c0, %c0_0] : memref<64x512xf32, #tpu.memory_space<vmem>>, vector<8x512xf32>
    %c0_1 = arith.constant 0 : index
    %c0_2 = arith.constant 0 : index
    %1 = vector.load %arg2[%c0_1, %c0_2] : memref<64x512xf32, #tpu.memory_space<vmem>>, vector<8x512xf32>
    %2 = math.absf %0 : vector<8x512xf32>
    %cst = arith.constant 0.000000e+00 : f32
    %3 = vector.broadcast %cst : f32 to vector<8x512xf32>
    %4 = arith.subf %3, %2 : vector<8x512xf32>
    %5 = math.exp %4 : vector<8x512xf32>
    %cst_3 = arith.constant 1.000000e+00 : f32
    %6 = vector.broadcast %cst_3 : f32 to vector<8x512xf32>
    %7 = arith.addf %6, %5 : vector<8x512xf32>
    %cst_4 = arith.constant 0.000000e+00 : f32
    %8 = vector.broadcast %cst_4 : f32 to vector<8x512xf32>
    %9 = arith.maximumf %0, %8 : vector<8x512xf32>
    %10 = arith.mulf %0, %1 : vector<8x512xf32>
    %11 = arith.subf %9, %10 : vector<8x512xf32>
    %12 = math.log %7 : vector<8x512xf32>
    %13 = arith.addf %11, %12 : vector<8x512xf32>
    %14 = tpu.reciprocal %7 {approx = true} : vector<8x512xf32> -> vector<8x512xf32>
    %cst_5 = arith.constant 0.000000e+00 : f32
    %15 = vector.broadcast %cst_5 : f32 to vector<8x512xf32>
    %16 = arith.cmpf oge, %0, %15 : vector<8x512xf32>
    %17 = arith.mulf %5, %14 : vector<8x512xf32>
    %18 = arith.select %16, %14, %17 : vector<8x512xi1>, vector<8x512xf32>
    %19 = arith.addf %18, %1 : vector<8x512xf32>
    %cst_6 = arith.constant 2.000000e+00 : f32
    %20 = vector.broadcast %cst_6 : f32 to vector<8x512xf32>
    %21 = arith.mulf %20, %18 : vector<8x512xf32>
    %22 = arith.mulf %21, %1 : vector<8x512xf32>
    %23 = arith.subf %19, %22 : vector<8x512xf32>
    %cst_7 = arith.constant -5.000000e-01 : f32
    %24 = vector.broadcast %cst_7 : f32 to vector<8x512xf32>
    %25 = arith.mulf %24, %1 : vector<8x512xf32>
    %cst_8 = arith.constant 7.500000e-01 : f32
    %26 = vector.broadcast %cst_8 : f32 to vector<8x512xf32>
    %27 = arith.addf %25, %26 : vector<8x512xf32>
    %28 = arith.mulf %23, %23 : vector<8x512xf32>
    %29 = arith.mulf %27, %28 : vector<8x512xf32>
    %30 = arith.mulf %29, %13 : vector<8x512xf32>
    %c1_i32 = arith.constant 1 : i32
    %c8_i32 = arith.constant 8 : i32
    %31 = arith.muli %c1_i32, %c8_i32 : i32
    %32 = tpu.assume_multiple %31, 8 : i32
    %33 = arith.index_cast %32 : i32 to index
    %c0_9 = arith.constant 0 : index
    %34 = vector.load %arg1[%33, %c0_9] : memref<64x512xf32, #tpu.memory_space<vmem>>, vector<8x512xf32>
    %35 = arith.index_cast %32 : i32 to index
    %c0_10 = arith.constant 0 : index
    %36 = vector.load %arg2[%35, %c0_10] : memref<64x512xf32, #tpu.memory_space<vmem>>, vector<8x512xf32>
    %37 = math.absf %34 : vector<8x512xf32>
    %cst_11 = arith.constant 0.000000e+00 : f32
    %38 = vector.broadcast %cst_11 : f32 to vector<8x512xf32>
    %39 = arith.subf %38, %37 : vector<8x512xf32>
    %40 = math.exp %39 : vector<8x512xf32>
    %cst_12 = arith.constant 1.000000e+00 : f32
    %41 = vector.broadcast %cst_12 : f32 to vector<8x512xf32>
    %42 = arith.addf %41, %40 : vector<8x512xf32>
    %cst_13 = arith.constant 0.000000e+00 : f32
    %43 = vector.broadcast %cst_13 : f32 to vector<8x512xf32>
    %44 = arith.maximumf %34, %43 : vector<8x512xf32>
    %45 = arith.mulf %34, %36 : vector<8x512xf32>
    %46 = arith.subf %44, %45 : vector<8x512xf32>
    %47 = math.log %42 : vector<8x512xf32>
    %48 = arith.addf %46, %47 : vector<8x512xf32>
    %49 = tpu.reciprocal %42 {approx = true} : vector<8x512xf32> -> vector<8x512xf32>
    %cst_14 = arith.constant 0.000000e+00 : f32
    %50 = vector.broadcast %cst_14 : f32 to vector<8x512xf32>
    %51 = arith.cmpf oge, %34, %50 : vector<8x512xf32>
    %52 = arith.mulf %40, %49 : vector<8x512xf32>
    %53 = arith.select %51, %49, %52 : vector<8x512xi1>, vector<8x512xf32>
    %54 = arith.addf %53, %36 : vector<8x512xf32>
    %cst_15 = arith.constant 2.000000e+00 : f32
    %55 = vector.broadcast %cst_15 : f32 to vector<8x512xf32>
    %56 = arith.mulf %55, %53 : vector<8x512xf32>
    %57 = arith.mulf %56, %36 : vector<8x512xf32>
    %58 = arith.subf %54, %57 : vector<8x512xf32>
    %cst_16 = arith.constant -5.000000e-01 : f32
    %59 = vector.broadcast %cst_16 : f32 to vector<8x512xf32>
    %60 = arith.mulf %59, %36 : vector<8x512xf32>
    %cst_17 = arith.constant 7.500000e-01 : f32
    %61 = vector.broadcast %cst_17 : f32 to vector<8x512xf32>
    %62 = arith.addf %60, %61 : vector<8x512xf32>
    %63 = arith.mulf %58, %58 : vector<8x512xf32>
    %64 = arith.mulf %62, %63 : vector<8x512xf32>
    %65 = arith.mulf %64, %48 : vector<8x512xf32>
    %66 = arith.addf %30, %65 : vector<8x512xf32>
    %c2_i32 = arith.constant 2 : i32
    %c8_i32_18 = arith.constant 8 : i32
    %67 = arith.muli %c2_i32, %c8_i32_18 : i32
    %68 = tpu.assume_multiple %67, 8 : i32
    %69 = arith.index_cast %68 : i32 to index
    %c0_19 = arith.constant 0 : index
    %70 = vector.load %arg1[%69, %c0_19] : memref<64x512xf32, #tpu.memory_space<vmem>>, vector<8x512xf32>
    %71 = arith.index_cast %68 : i32 to index
    %c0_20 = arith.constant 0 : index
    %72 = vector.load %arg2[%71, %c0_20] : memref<64x512xf32, #tpu.memory_space<vmem>>, vector<8x512xf32>
    %73 = math.absf %70 : vector<8x512xf32>
    %cst_21 = arith.constant 0.000000e+00 : f32
    %74 = vector.broadcast %cst_21 : f32 to vector<8x512xf32>
    %75 = arith.subf %74, %73 : vector<8x512xf32>
    %76 = math.exp %75 : vector<8x512xf32>
    %cst_22 = arith.constant 1.000000e+00 : f32
    %77 = vector.broadcast %cst_22 : f32 to vector<8x512xf32>
    %78 = arith.addf %77, %76 : vector<8x512xf32>
    %cst_23 = arith.constant 0.000000e+00 : f32
    %79 = vector.broadcast %cst_23 : f32 to vector<8x512xf32>
    %80 = arith.maximumf %70, %79 : vector<8x512xf32>
    %81 = arith.mulf %70, %72 : vector<8x512xf32>
    %82 = arith.subf %80, %81 : vector<8x512xf32>
    %83 = math.log %78 : vector<8x512xf32>
    %84 = arith.addf %82, %83 : vector<8x512xf32>
    %85 = tpu.reciprocal %78 {approx = true} : vector<8x512xf32> -> vector<8x512xf32>
    %cst_24 = arith.constant 0.000000e+00 : f32
    %86 = vector.broadcast %cst_24 : f32 to vector<8x512xf32>
    %87 = arith.cmpf oge, %70, %86 : vector<8x512xf32>
    %88 = arith.mulf %76, %85 : vector<8x512xf32>
    %89 = arith.select %87, %85, %88 : vector<8x512xi1>, vector<8x512xf32>
    %90 = arith.addf %89, %72 : vector<8x512xf32>
    %cst_25 = arith.constant 2.000000e+00 : f32
    %91 = vector.broadcast %cst_25 : f32 to vector<8x512xf32>
    %92 = arith.mulf %91, %89 : vector<8x512xf32>
    %93 = arith.mulf %92, %72 : vector<8x512xf32>
    %94 = arith.subf %90, %93 : vector<8x512xf32>
    %cst_26 = arith.constant -5.000000e-01 : f32
    %95 = vector.broadcast %cst_26 : f32 to vector<8x512xf32>
    %96 = arith.mulf %95, %72 : vector<8x512xf32>
    %cst_27 = arith.constant 7.500000e-01 : f32
    %97 = vector.broadcast %cst_27 : f32 to vector<8x512xf32>
    %98 = arith.addf %96, %97 : vector<8x512xf32>
    %99 = arith.mulf %94, %94 : vector<8x512xf32>
    %100 = arith.mulf %98, %99 : vector<8x512xf32>
    %101 = arith.mulf %100, %84 : vector<8x512xf32>
    %102 = arith.addf %66, %101 : vector<8x512xf32>
    %c3_i32 = arith.constant 3 : i32
    %c8_i32_28 = arith.constant 8 : i32
    %103 = arith.muli %c3_i32, %c8_i32_28 : i32
    %104 = tpu.assume_multiple %103, 8 : i32
    %105 = arith.index_cast %104 : i32 to index
    %c0_29 = arith.constant 0 : index
    %106 = vector.load %arg1[%105, %c0_29] : memref<64x512xf32, #tpu.memory_space<vmem>>, vector<8x512xf32>
    %107 = arith.index_cast %104 : i32 to index
    %c0_30 = arith.constant 0 : index
    %108 = vector.load %arg2[%107, %c0_30] : memref<64x512xf32, #tpu.memory_space<vmem>>, vector<8x512xf32>
    %109 = math.absf %106 : vector<8x512xf32>
    %cst_31 = arith.constant 0.000000e+00 : f32
    %110 = vector.broadcast %cst_31 : f32 to vector<8x512xf32>
    %111 = arith.subf %110, %109 : vector<8x512xf32>
    %112 = math.exp %111 : vector<8x512xf32>
    %cst_32 = arith.constant 1.000000e+00 : f32
    %113 = vector.broadcast %cst_32 : f32 to vector<8x512xf32>
    %114 = arith.addf %113, %112 : vector<8x512xf32>
    %cst_33 = arith.constant 0.000000e+00 : f32
    %115 = vector.broadcast %cst_33 : f32 to vector<8x512xf32>
    %116 = arith.maximumf %106, %115 : vector<8x512xf32>
    %117 = arith.mulf %106, %108 : vector<8x512xf32>
    %118 = arith.subf %116, %117 : vector<8x512xf32>
    %119 = math.log %114 : vector<8x512xf32>
    %120 = arith.addf %118, %119 : vector<8x512xf32>
    %121 = tpu.reciprocal %114 {approx = true} : vector<8x512xf32> -> vector<8x512xf32>
    %cst_34 = arith.constant 0.000000e+00 : f32
    %122 = vector.broadcast %cst_34 : f32 to vector<8x512xf32>
    %123 = arith.cmpf oge, %106, %122 : vector<8x512xf32>
    %124 = arith.mulf %112, %121 : vector<8x512xf32>
    %125 = arith.select %123, %121, %124 : vector<8x512xi1>, vector<8x512xf32>
    %126 = arith.addf %125, %108 : vector<8x512xf32>
    %cst_35 = arith.constant 2.000000e+00 : f32
    %127 = vector.broadcast %cst_35 : f32 to vector<8x512xf32>
    %128 = arith.mulf %127, %125 : vector<8x512xf32>
    %129 = arith.mulf %128, %108 : vector<8x512xf32>
    %130 = arith.subf %126, %129 : vector<8x512xf32>
    %cst_36 = arith.constant -5.000000e-01 : f32
    %131 = vector.broadcast %cst_36 : f32 to vector<8x512xf32>
    %132 = arith.mulf %131, %108 : vector<8x512xf32>
    %cst_37 = arith.constant 7.500000e-01 : f32
    %133 = vector.broadcast %cst_37 : f32 to vector<8x512xf32>
    %134 = arith.addf %132, %133 : vector<8x512xf32>
    %135 = arith.mulf %130, %130 : vector<8x512xf32>
    %136 = arith.mulf %134, %135 : vector<8x512xf32>
    %137 = arith.mulf %136, %120 : vector<8x512xf32>
    %138 = arith.addf %102, %137 : vector<8x512xf32>
    %c4_i32 = arith.constant 4 : i32
    %c8_i32_38 = arith.constant 8 : i32
    %139 = arith.muli %c4_i32, %c8_i32_38 : i32
    %140 = tpu.assume_multiple %139, 8 : i32
    %141 = arith.index_cast %140 : i32 to index
    %c0_39 = arith.constant 0 : index
    %142 = vector.load %arg1[%141, %c0_39] : memref<64x512xf32, #tpu.memory_space<vmem>>, vector<8x512xf32>
    %143 = arith.index_cast %140 : i32 to index
    %c0_40 = arith.constant 0 : index
    %144 = vector.load %arg2[%143, %c0_40] : memref<64x512xf32, #tpu.memory_space<vmem>>, vector<8x512xf32>
    %145 = math.absf %142 : vector<8x512xf32>
    %cst_41 = arith.constant 0.000000e+00 : f32
    %146 = vector.broadcast %cst_41 : f32 to vector<8x512xf32>
    %147 = arith.subf %146, %145 : vector<8x512xf32>
    %148 = math.exp %147 : vector<8x512xf32>
    %cst_42 = arith.constant 1.000000e+00 : f32
    %149 = vector.broadcast %cst_42 : f32 to vector<8x512xf32>
    %150 = arith.addf %149, %148 : vector<8x512xf32>
    %cst_43 = arith.constant 0.000000e+00 : f32
    %151 = vector.broadcast %cst_43 : f32 to vector<8x512xf32>
    %152 = arith.maximumf %142, %151 : vector<8x512xf32>
    %153 = arith.mulf %142, %144 : vector<8x512xf32>
    %154 = arith.subf %152, %153 : vector<8x512xf32>
    %155 = math.log %150 : vector<8x512xf32>
    %156 = arith.addf %154, %155 : vector<8x512xf32>
    %157 = tpu.reciprocal %150 {approx = true} : vector<8x512xf32> -> vector<8x512xf32>
    %cst_44 = arith.constant 0.000000e+00 : f32
    %158 = vector.broadcast %cst_44 : f32 to vector<8x512xf32>
    %159 = arith.cmpf oge, %142, %158 : vector<8x512xf32>
    %160 = arith.mulf %148, %157 : vector<8x512xf32>
    %161 = arith.select %159, %157, %160 : vector<8x512xi1>, vector<8x512xf32>
    %162 = arith.addf %161, %144 : vector<8x512xf32>
    %cst_45 = arith.constant 2.000000e+00 : f32
    %163 = vector.broadcast %cst_45 : f32 to vector<8x512xf32>
    %164 = arith.mulf %163, %161 : vector<8x512xf32>
    %165 = arith.mulf %164, %144 : vector<8x512xf32>
    %166 = arith.subf %162, %165 : vector<8x512xf32>
    %cst_46 = arith.constant -5.000000e-01 : f32
    %167 = vector.broadcast %cst_46 : f32 to vector<8x512xf32>
    %168 = arith.mulf %167, %144 : vector<8x512xf32>
    %cst_47 = arith.constant 7.500000e-01 : f32
    %169 = vector.broadcast %cst_47 : f32 to vector<8x512xf32>
    %170 = arith.addf %168, %169 : vector<8x512xf32>
    %171 = arith.mulf %166, %166 : vector<8x512xf32>
    %172 = arith.mulf %170, %171 : vector<8x512xf32>
    %173 = arith.mulf %172, %156 : vector<8x512xf32>
    %174 = arith.addf %138, %173 : vector<8x512xf32>
    %c5_i32 = arith.constant 5 : i32
    %c8_i32_48 = arith.constant 8 : i32
    %175 = arith.muli %c5_i32, %c8_i32_48 : i32
    %176 = tpu.assume_multiple %175, 8 : i32
    %177 = arith.index_cast %176 : i32 to index
    %c0_49 = arith.constant 0 : index
    %178 = vector.load %arg1[%177, %c0_49] : memref<64x512xf32, #tpu.memory_space<vmem>>, vector<8x512xf32>
    %179 = arith.index_cast %176 : i32 to index
    %c0_50 = arith.constant 0 : index
    %180 = vector.load %arg2[%179, %c0_50] : memref<64x512xf32, #tpu.memory_space<vmem>>, vector<8x512xf32>
    %181 = math.absf %178 : vector<8x512xf32>
    %cst_51 = arith.constant 0.000000e+00 : f32
    %182 = vector.broadcast %cst_51 : f32 to vector<8x512xf32>
    %183 = arith.subf %182, %181 : vector<8x512xf32>
    %184 = math.exp %183 : vector<8x512xf32>
    %cst_52 = arith.constant 1.000000e+00 : f32
    %185 = vector.broadcast %cst_52 : f32 to vector<8x512xf32>
    %186 = arith.addf %185, %184 : vector<8x512xf32>
    %cst_53 = arith.constant 0.000000e+00 : f32
    %187 = vector.broadcast %cst_53 : f32 to vector<8x512xf32>
    %188 = arith.maximumf %178, %187 : vector<8x512xf32>
    %189 = arith.mulf %178, %180 : vector<8x512xf32>
    %190 = arith.subf %188, %189 : vector<8x512xf32>
    %191 = math.log %186 : vector<8x512xf32>
    %192 = arith.addf %190, %191 : vector<8x512xf32>
    %193 = tpu.reciprocal %186 {approx = true} : vector<8x512xf32> -> vector<8x512xf32>
    %cst_54 = arith.constant 0.000000e+00 : f32
    %194 = vector.broadcast %cst_54 : f32 to vector<8x512xf32>
    %195 = arith.cmpf oge, %178, %194 : vector<8x512xf32>
    %196 = arith.mulf %184, %193 : vector<8x512xf32>
    %197 = arith.select %195, %193, %196 : vector<8x512xi1>, vector<8x512xf32>
    %198 = arith.addf %197, %180 : vector<8x512xf32>
    %cst_55 = arith.constant 2.000000e+00 : f32
    %199 = vector.broadcast %cst_55 : f32 to vector<8x512xf32>
    %200 = arith.mulf %199, %197 : vector<8x512xf32>
    %201 = arith.mulf %200, %180 : vector<8x512xf32>
    %202 = arith.subf %198, %201 : vector<8x512xf32>
    %cst_56 = arith.constant -5.000000e-01 : f32
    %203 = vector.broadcast %cst_56 : f32 to vector<8x512xf32>
    %204 = arith.mulf %203, %180 : vector<8x512xf32>
    %cst_57 = arith.constant 7.500000e-01 : f32
    %205 = vector.broadcast %cst_57 : f32 to vector<8x512xf32>
    %206 = arith.addf %204, %205 : vector<8x512xf32>
    %207 = arith.mulf %202, %202 : vector<8x512xf32>
    %208 = arith.mulf %206, %207 : vector<8x512xf32>
    %209 = arith.mulf %208, %192 : vector<8x512xf32>
    %210 = arith.addf %174, %209 : vector<8x512xf32>
    %c6_i32 = arith.constant 6 : i32
    %c8_i32_58 = arith.constant 8 : i32
    %211 = arith.muli %c6_i32, %c8_i32_58 : i32
    %212 = tpu.assume_multiple %211, 8 : i32
    %213 = arith.index_cast %212 : i32 to index
    %c0_59 = arith.constant 0 : index
    %214 = vector.load %arg1[%213, %c0_59] : memref<64x512xf32, #tpu.memory_space<vmem>>, vector<8x512xf32>
    %215 = arith.index_cast %212 : i32 to index
    %c0_60 = arith.constant 0 : index
    %216 = vector.load %arg2[%215, %c0_60] : memref<64x512xf32, #tpu.memory_space<vmem>>, vector<8x512xf32>
    %217 = math.absf %214 : vector<8x512xf32>
    %cst_61 = arith.constant 0.000000e+00 : f32
    %218 = vector.broadcast %cst_61 : f32 to vector<8x512xf32>
    %219 = arith.subf %218, %217 : vector<8x512xf32>
    %220 = math.exp %219 : vector<8x512xf32>
    %cst_62 = arith.constant 1.000000e+00 : f32
    %221 = vector.broadcast %cst_62 : f32 to vector<8x512xf32>
    %222 = arith.addf %221, %220 : vector<8x512xf32>
    %cst_63 = arith.constant 0.000000e+00 : f32
    %223 = vector.broadcast %cst_63 : f32 to vector<8x512xf32>
    %224 = arith.maximumf %214, %223 : vector<8x512xf32>
    %225 = arith.mulf %214, %216 : vector<8x512xf32>
    %226 = arith.subf %224, %225 : vector<8x512xf32>
    %227 = math.log %222 : vector<8x512xf32>
    %228 = arith.addf %226, %227 : vector<8x512xf32>
    %229 = tpu.reciprocal %222 {approx = true} : vector<8x512xf32> -> vector<8x512xf32>
    %cst_64 = arith.constant 0.000000e+00 : f32
    %230 = vector.broadcast %cst_64 : f32 to vector<8x512xf32>
    %231 = arith.cmpf oge, %214, %230 : vector<8x512xf32>
    %232 = arith.mulf %220, %229 : vector<8x512xf32>
    %233 = arith.select %231, %229, %232 : vector<8x512xi1>, vector<8x512xf32>
    %234 = arith.addf %233, %216 : vector<8x512xf32>
    %cst_65 = arith.constant 2.000000e+00 : f32
    %235 = vector.broadcast %cst_65 : f32 to vector<8x512xf32>
    %236 = arith.mulf %235, %233 : vector<8x512xf32>
    %237 = arith.mulf %236, %216 : vector<8x512xf32>
    %238 = arith.subf %234, %237 : vector<8x512xf32>
    %cst_66 = arith.constant -5.000000e-01 : f32
    %239 = vector.broadcast %cst_66 : f32 to vector<8x512xf32>
    %240 = arith.mulf %239, %216 : vector<8x512xf32>
    %cst_67 = arith.constant 7.500000e-01 : f32
    %241 = vector.broadcast %cst_67 : f32 to vector<8x512xf32>
    %242 = arith.addf %240, %241 : vector<8x512xf32>
    %243 = arith.mulf %238, %238 : vector<8x512xf32>
    %244 = arith.mulf %242, %243 : vector<8x512xf32>
    %245 = arith.mulf %244, %228 : vector<8x512xf32>
    %246 = arith.addf %210, %245 : vector<8x512xf32>
    %c7_i32 = arith.constant 7 : i32
    %c8_i32_68 = arith.constant 8 : i32
    %247 = arith.muli %c7_i32, %c8_i32_68 : i32
    %248 = tpu.assume_multiple %247, 8 : i32
    %249 = arith.index_cast %248 : i32 to index
    %c0_69 = arith.constant 0 : index
    %250 = vector.load %arg1[%249, %c0_69] : memref<64x512xf32, #tpu.memory_space<vmem>>, vector<8x512xf32>
    %251 = arith.index_cast %248 : i32 to index
    %c0_70 = arith.constant 0 : index
    %252 = vector.load %arg2[%251, %c0_70] : memref<64x512xf32, #tpu.memory_space<vmem>>, vector<8x512xf32>
    %253 = math.absf %250 : vector<8x512xf32>
    %cst_71 = arith.constant 0.000000e+00 : f32
    %254 = vector.broadcast %cst_71 : f32 to vector<8x512xf32>
    %255 = arith.subf %254, %253 : vector<8x512xf32>
    %256 = math.exp %255 : vector<8x512xf32>
    %cst_72 = arith.constant 1.000000e+00 : f32
    %257 = vector.broadcast %cst_72 : f32 to vector<8x512xf32>
    %258 = arith.addf %257, %256 : vector<8x512xf32>
    %cst_73 = arith.constant 0.000000e+00 : f32
    %259 = vector.broadcast %cst_73 : f32 to vector<8x512xf32>
    %260 = arith.maximumf %250, %259 : vector<8x512xf32>
    %261 = arith.mulf %250, %252 : vector<8x512xf32>
    %262 = arith.subf %260, %261 : vector<8x512xf32>
    %263 = math.log %258 : vector<8x512xf32>
    %264 = arith.addf %262, %263 : vector<8x512xf32>
    %265 = tpu.reciprocal %258 {approx = true} : vector<8x512xf32> -> vector<8x512xf32>
    %cst_74 = arith.constant 0.000000e+00 : f32
    %266 = vector.broadcast %cst_74 : f32 to vector<8x512xf32>
    %267 = arith.cmpf oge, %250, %266 : vector<8x512xf32>
    %268 = arith.mulf %256, %265 : vector<8x512xf32>
    %269 = arith.select %267, %265, %268 : vector<8x512xi1>, vector<8x512xf32>
    %270 = arith.addf %269, %252 : vector<8x512xf32>
    %cst_75 = arith.constant 2.000000e+00 : f32
    %271 = vector.broadcast %cst_75 : f32 to vector<8x512xf32>
    %272 = arith.mulf %271, %269 : vector<8x512xf32>
    %273 = arith.mulf %272, %252 : vector<8x512xf32>
    %274 = arith.subf %270, %273 : vector<8x512xf32>
    %cst_76 = arith.constant -5.000000e-01 : f32
    %275 = vector.broadcast %cst_76 : f32 to vector<8x512xf32>
    %276 = arith.mulf %275, %252 : vector<8x512xf32>
    %cst_77 = arith.constant 7.500000e-01 : f32
    %277 = vector.broadcast %cst_77 : f32 to vector<8x512xf32>
    %278 = arith.addf %276, %277 : vector<8x512xf32>
    %279 = arith.mulf %274, %274 : vector<8x512xf32>
    %280 = arith.mulf %278, %279 : vector<8x512xf32>
    %281 = arith.mulf %280, %264 : vector<8x512xf32>
    %282 = arith.addf %246, %281 : vector<8x512xf32>
    %c7_i32_78 = arith.constant 7 : i32
    %283 = vector.shape_cast %282 : vector<8x512xf32> to vector<1x8x512xf32>
    %c0_79 = arith.constant 0 : index
    %c0_80 = arith.constant 0 : index
    %c0_81 = arith.constant 0 : index
    %284 = vector.load %arg3[%c0_79, %c0_80, %c0_81] : memref<1x8x512xf32, #tpu.memory_space<vmem>>, vector<1x8x512xf32>
    tpu.vector_store %arg3[%c0_79, %c0_80, %c0_81], %283 {strides = array<i32>} : memref<1x8x512xf32, #tpu.memory_space<vmem>>, vector<1x8x512xf32>,
    return
  }
  func.func @transform_0(%arg0: i32) -> (i32, i32) {
    %c0_i32 = arith.constant 0 : i32
    %c0_i32_0 = arith.constant 0 : i32
    return %arg0, %c0_i32 : i32, i32
  }
  func.func @transform_1(%arg0: i32) -> (i32, i32) {
    %c0_i32 = arith.constant 0 : i32
    %c0_i32_0 = arith.constant 0 : i32
    return %arg0, %c0_i32 : i32, i32
  }
  func.func @transform_2(%arg0: i32) -> (i32, i32, i32) {
    %c0_i32 = arith.constant 0 : i32
    %c0_i32_0 = arith.constant 0 : i32
    %c0_i32_1 = arith.constant 0 : i32
    return %arg0, %c0_i32, %c0_i32_0 : i32, i32, i32
  }
}

</mosaic_0001>

<bundles_post_ra>
// kernel: tpu_custom_call.1
= control target key start
LH: loop header
LB: loop body
LE: loop exit
PB: predicated region body
PF: predicated region fallthrough
CT: control target
= control target key end

     0   :  { %7 = vsyncpa [#allocation3], 0  ;;  %s2221_s0 = inlined_call_operand.hbm [shape: f32[64,512], index: 0, kind: input, shape index: {}]   ;;  %s2222_s1 = inlined_call_operand.hbm [shape: f32[64,512], index: 1, kind: input, shape index: {}]   ;;  %s2223_s2 = inlined_call_operand.hbm [shape: f32[1,8,512], index: 2, kind: output, shape index: {}]  }
   0x1   :  { %8 = vsyncpa [#allocation6], 0 }
   0x2   :  { %9 = vsyncpa [#allocation4], 0  ;;  %s1238_s9 = smov [#allocation2]   ;;  %s1166_s13 = scalar_lea.hbm %s2221_s0, 4096 }
   0x3   :  { %s15_s10 = sshll.u32 %s1238_s9, 4  ;;  %p1167_p0 = scmp.ne.s32.totalorder %s2221_s0, %s1166_s13  ;;  %s16_s10 = int_to_ptr.vmem [resolvable:$true] %s15_s10 }
   0x4   :  { %p1170_p1 = scmp.lt.u32.totalorder %s1166_s13, %s2221_s0 }
   0x6   :  { %p1172_p2 = pnand %p1170_p1, %p1167_p0 }
   0x8   :  { %1175 = shalt.err (!%p1172_p2)
}
   0x9   :  { %s1176_s18 = scalar_lea.vmem %s16_s10, 4096  ;;  %p1181_p4 = scmp.lt.s32.totalorder %s16_s10, %s16_s10 }
   0xa   :  { %p1177_p3 = scmp.ne.s32.totalorder %s16_s10, %s1176_s18  ;;  %p1182_p5 = scmp.lt.s32.totalorder %s1176_s18, %s1176_s18 }
   0xc   :  { %p1183_p6 = por %p1182_p5, %p1181_p4 }
   0xe   :  { %p1184_p7 = pnand %p1183_p6, %p1177_p3 }
  0x10   :  { %1187 = shalt.err (!%p1184_p7)
}
  0x11   :  { %s1239_s19 = smov 512   ;;  %s1240_s20 = smov 32  }
  0x12   :  { %21 = dma.hbm_to_vmem [thread:$0]  %s2221_s0, 4096, %s16_s10, [#allocation3], %s1239_s19, %s1239_s19, %s1240_s20  }
  0x13   :  { %s1241_s23 = smov [#allocation5]   ;;  %s1188_s27 = scalar_lea.hbm %s2222_s1, 4096 }
  0x14   :  { %s27_s24 = sshll.u32 %s1241_s23, 4  ;;  %p1189_p8 = scmp.ne.s32.totalorder %s2222_s1, %s1188_s27  ;;  %s28_s24 = int_to_ptr.vmem [resolvable:$true] %s27_s24 }
  0x15   :  { %p1192_p9 = scmp.lt.u32.totalorder %s1188_s27, %s2222_s1 }
  0x17   :  { %p1194_p10 = pnand %p1192_p9, %p1189_p8 }
  0x19   :  { %1197 = shalt.err (!%p1194_p10)
}
  0x1a   :  { %s1198_s4 = scalar_lea.vmem %s28_s24, 4096  ;;  %p1203_p12 = scmp.lt.s32.totalorder %s28_s24, %s28_s24 }
  0x1b   :  { %p1199_p11 = scmp.ne.s32.totalorder %s28_s24, %s1198_s4  ;;  %p1204_p13 = scmp.lt.s32.totalorder %s1198_s4, %s1198_s4 }
  0x1d   :  { %p1205_p0 = por %p1204_p13, %p1203_p12 }
  0x1f   :  { %p1206_p1 = pnand %p1205_p0, %p1199_p11 }
  0x21   :  { %1209 = shalt.err (!%p1206_p1)
}
  0x22   :  { %33 = dma.hbm_to_vmem [thread:$0]  %s2222_s1, 4096, %s28_s24, [#allocation6], %s1239_s19, %s1239_s19, %s1240_s20  }
  0x23   :  { %1232 = dma.done.wait [#allocation3], 4096  }
  0x24   :  { %1233 = vsyncadd [#allocation3], 4294963200 }
  0x25   :  { %1234 = dma.done.wait [#allocation6], 4096  }
  0x26   :  { %1235 = vsyncadd [#allocation6], 4294963200  ;;  %v1282_v0 = vld [vmem:[#allocation2] sm:$0xff]  ;;  %v1284_v1 = vld [vmem:[#allocation2 + $0x8] sm:$0xff]  ;;  %s1242_s1 = smov [#allocation7]  }
  0x27   :  { %v1286_v2 = vld [vmem:[#allocation2 + $0x10] sm:$0xff]  ;;  %v48_v3 = vand.u32 2147483647, %v1282_v0  ;;  %v1289_v4 = vld [vmem:[#allocation2 + $0x18] sm:$0xff]  ;;  %v49_v5 = vand.u32 2147483647, %v1284_v1 }
  0x28   :  { %v50_v6 = vand.u32 2147483647, %v1286_v2  ;;  %v51_v8 = vand.u32 2147483647, %v1289_v4  ;;  %v1294_v12 = vld [vmem:[#allocation2 + $0x20] sm:$0xff]  ;;  %v1296_v13 = vld [vmem:[#allocation2 + $0x28] sm:$0xff] }
  0x29   :  { %v52_v7 = vsub.f32 0.0, %v48_v3  ;;  %v53_v9 = vsub.f32 0.0, %v49_v5  ;;  %v1298_v14 = vld [vmem:[#allocation2 + $0x30] sm:$0xff]  ;;  %v1300_v16 = vld [vmem:[#allocation2 + $0x38] sm:$0xff]  ;;  %v157_v18 = vand.u32 2147483647, %v1294_v12 }
  0x2a   :  { %v54_v10 = vsub.f32 0.0, %v50_v6  ;;  %v55_v15 = vsub.f32 0.0, %v51_v8  ;;  %v158_v19 = vand.u32 2147483647, %v1296_v13  ;;  %v159_v21 = vand.u32 2147483647, %v1298_v14 }
  0x2b   :  { %v56_v11 = vmul.f32 1.442695, %v52_v7  ;;  %v58_v17 = vmul.f32 1.442695, %v53_v9  ;;  %v160_v22 = vand.u32 2147483647, %v1300_v16 }
  0x2c   :  { %v60_v20 = vmul.f32 1.442695, %v54_v10  ;;  %v161_v23 = vsub.f32 0.0, %v157_v18  ;;  %v162_v24 = vsub.f32 0.0, %v158_v19  ;;  %v62_v25 = vmul.f32 1.442695, %v55_v15 }
  0x2d   :  { %974 = vpow2.f32 %v56_v11  ;;  %v163_v26 = vsub.f32 0.0, %v159_v21  ;;  %v164_v27 = vsub.f32 0.0, %v160_v22  ;;  %v1306_v32 = vld [vmem:[#allocation2 + $0x40] sm:$0xff]  ;;  %v1312_v35 = vld [vmem:[#allocation5 + $0x8] sm:$0xff]  ;;  %v68_v36 = vmax.f32 %v1282_v0, 0.0  ;;  %v1317_v38 = vld [vmem:[#allocation5 + $0x10] sm:$0xff] }
  0x2e   :  { %976 = vpow2.f32 %v58_v17  ;;  %v165_v28 = vmul.f32 1.442695, %v161_v23  ;;  %v167_v29 = vmul.f32 1.442695, %v162_v24  ;;  %v1310_v34 = vld [vmem:[#allocation5] sm:$0xff]  ;;  %v73_v39 = vmul.f32 %v1312_v35, %v1284_v1  ;;  %v1324_v42 = vld [vmem:[#allocation5 + $0x18] sm:$0xff] }
  0x2f   :  { %978 = vpow2.f32 %v60_v20  ;;  %v169_v30 = vmul.f32 1.442695, %v163_v26  ;;  %v171_v31 = vmul.f32 1.442695, %v164_v27  ;;  %v72_v37 = vmul.f32 %v1310_v34, %v1282_v0  ;;  %v1339_v52 = vld [vmem:[#allocation2 + $0x48] sm:$0xff]  ;;  %v1345_v56 = vld [vmem:[#allocation2 + $0x50] sm:$0xff] }
  0x30   :  { %980 = vpow2.f32 %v62_v25  ;;  %v270_v40 = vand.u32 2147483647, %v1306_v32  ;;  %v69_v44 = vmax.f32 %v1284_v1, 0.0  ;;  %v70_v45 = vmax.f32 %v1286_v2, 0.0  ;;  %v1374_v21 = vld [vmem:[#allocation5 + $0x20] sm:$0xff]  ;;  %v1379_v25 = vld [vmem:[#allocation5 + $0x28] sm:$0xff] }
  0x31   :  { %982 = vpow2.f32 %v165_v28  ;;  %v74_v46 = vmul.f32 %v1317_v38, %v1286_v2  ;;  %v71_v48 = vmax.f32 %v1289_v4, 0.0  ;;  %v75_v49 = vmul.f32 %v1324_v42, %v1289_v4  ;;  %v1381_v26 = vld [vmem:[#allocation5 + $0x30] sm:$0xff]  ;;  %s945_s6 = sshll.u32 %s1242_s1, 4  ;;  %s946_s6 = int_to_ptr.vmem [resolvable:$true] %s945_s6 }
  0x32   :  { %984 = vpow2.f32 %v167_v29  ;;  %v1336_v50 = vsub.f32 %v68_v36, %v72_v37  ;;  %v124_v51 = vmul.f32 -0.5, %v1310_v34  ;;  %v125_v55 = vmul.f32 -0.5, %v1312_v35  ;;  %s1210_s7 = scalar_lea.vmem %s946_s6, 512  ;;  %p1215_p3 = scmp.lt.s32.totalorder %s946_s6, %s946_s6 }
  0x33   :  { %986 = vpow2.f32 %v169_v30  ;;  %v274_v57 = vsub.f32 0.0, %v270_v40  ;;  %v1348_v59 = vsub.f32 %v69_v44, %v73_v39  ;;  %v1350_v60 = vsub.f32 %v70_v45, %v74_v46  ;;  %v1388_v30 = vld [vmem:[#allocation5 + $0x38] sm:$0xff]  ;;  %p1211_p2 = scmp.ne.s32.totalorder %s946_s6, %s1210_s7  ;;  %p1216_p4 = scmp.lt.s32.totalorder %s1210_s7, %s1210_s7 }
  0x34   :  { %988 = vpow2.f32 %v171_v31  ;;  %v1354_v62 = vsub.f32 %v71_v48, %v75_v49  ;;  %v126_v63 = vmul.f32 -0.5, %v1317_v38  ;;  %v271_v3 = vand.u32 2147483647, %v1339_v52  ;;  %v1397_v39 = vld [vmem:[#allocation2 + $0x58] sm:$0xff] }
  0x35   :  { %v127_v7 = vmul.f32 -0.5, %v1324_v42  ;;  %v272_v8 = vand.u32 2147483647, %v1345_v56  ;;  %v1365_v10 = vadd.f32 0.75, %v124_v51  ;;  %v1367_v11 = vadd.f32 0.75, %v125_v55  ;;  %2236 = vst [vmem:[#allocation13_spill] sm:$0xff] %v1397_v39  ;;  %p1217_p5 = por %p1216_p4, %p1215_p3 }
  0x36   :  { %v278_v15 = vmul.f32 1.442695, %v274_v57  ;;  %v177_v19 = vmax.f32 %v1294_v12, 0.0  ;;  %v178_v20 = vmax.f32 %v1296_v13, 0.0  ;;  %v179_v23 = vmax.f32 %v1298_v14, 0.0 }
  0x37   :  { %v1308_v33 = vpop.eup %974  ;;  %2234 = vst [vmem:[#allocation11_spill] sm:$0xff] %v1365_v10  ;;  %2235 = vst [vmem:[#allocation12_spill] sm:$0xff] %v1367_v11  ;;  %v275_v24 = vsub.f32 0.0, %v271_v3  ;;  %vm96_vm0 = vcmp.ge.f32.partialorder %v1282_v0, 0.0  ;;  %v181_v28 = vmul.f32 %v1374_v21, %v1294_v12  ;;  %v276_v29 = vsub.f32 0.0, %v272_v8  ;;  %p1218_p6 = pnand %p1217_p5, %p1211_p2 }
  0x38   :  { %v1322_v41 = vpop.eup %976  ;;  %v64_v43 = vadd.f32 1.0, %v1308_v33  ;;  %v182_v36 = vmul.f32 %v1379_v25, %v1296_v13  ;;  %v183_v37 = vmul.f32 %v1381_v26, %v1298_v14  ;;  %v1399_v40 = vadd.f32 0.75, %v126_v63 }
  0x39   :  { %v1331_v47 = vpop.eup %978  ;;  %v65_v54 = vadd.f32 1.0, %v1322_v41  ;;  %v184_v44 = vmul.f32 %v1388_v30, %v1300_v16  ;;  %vm97_vm1 = vcmp.ge.f32.partialorder %v1284_v1, 0.0  ;;  %v233_v46 = vmul.f32 -0.5, %v1374_v21 }
  0x3a   :  { %v1341_v53 = vpop.eup %980  ;;  %990 = vlog2.f32 %v64_v43  ;;  %v66_v58 = vadd.f32 1.0, %v1331_v47  ;;  %2237 = vst [vmem:[#allocation14_spill] sm:$0xff] %v1399_v40  ;;  %v234_v48 = vmul.f32 -0.5, %v1379_v25  ;;  %v280_v49 = vmul.f32 1.442695, %v275_v24 }
  0x3b   :  { %992 = vrcp.f32 %v64_v43  ;;  %v1352_v61 = vpop.eup %982  ;;  %v67_v6 = vadd.f32 1.0, %v1341_v53  ;;  %v180_v43 = vmax.f32 %v1300_v16, 0.0  ;;  %vm98_vm2 = vcmp.ge.f32.partialorder %v1286_v2, 0.0 }
  0x3c   :  { %994 = vlog2.f32 %v65_v54  ;;  %v1358_v5 = vpop.eup %984  ;;  %v173_v18 = vadd.f32 1.0, %v1352_v61  ;;  %v273_v55 = vand.u32 2147483647, %v1397_v39  ;;  %v282_v57 = vmul.f32 1.442695, %v276_v29 }
  0x3d   :  { %996 = vlog2.f32 %v66_v58  ;;  %v1363_v9 = vpop.eup %986  ;;  %v174_v22 = vadd.f32 1.0, %v1358_v5  ;;  %v1412_v63 = vsub.f32 %v177_v19, %v181_v28  ;;  %v1414_v3 = vsub.f32 %v178_v20, %v182_v36  ;;  %v1429_v36 = vld [vmem:[#allocation5 + $0x40] sm:$0xff] }
  0x3e   :  { %998 = vrcp.f32 %v65_v54  ;;  %v1369_v17 = vpop.eup %988  ;;  %v1384_v27 = vadd.f32 1.0, %v1363_v9  ;;  %v1408_v54 = vadd.f32 0.75, %v127_v7  ;;  %vm99_vm3 = vcmp.ge.f32.partialorder %v1289_v4, 0.0  ;;  %2244 = vst [vmem:[#allocation21_spill] sm:$0xff] %v1429_v36 }
  0x3f   :  { %1000 = vrcp.f32 %v66_v58  ;;  %v1391_v31 = vadd.f32 1.0, %v1369_v17  ;;  %2239 = vst [vmem:[#allocation16_spill] sm:$0xff] %v1414_v3  ;;  %v235_v7 = vmul.f32 -0.5, %v1381_v26  ;;  %v236_v24 = vmul.f32 -0.5, %v1388_v30 }
  0x40   :  { %1002 = vlog2.f32 %v67_v6  ;;  %2238 = vst [vmem:[#allocation15_spill] sm:$0xff] %v1408_v54  ;;  %v1425_v28 = vadd.f32 0.75, %v233_v46  ;;  %v1427_v20 = vadd.f32 0.75, %v234_v48  ;;  %vm205_vm4 = vcmp.ge.f32.partialorder %v1294_v12, 0.0  ;;  %v1437_v46 = vld [vmem:[#allocation5 + $0x50] sm:$0xff] }
  0x41   :  { %1004 = vrcp.f32 %v67_v6  ;;  %v1416_v6 = vsub.f32 %v179_v23, %v183_v37  ;;  %v277_v37 = vsub.f32 0.0, %v273_v55  ;;  %vm206_vm5 = vcmp.ge.f32.partialorder %v1296_v13, 0.0  ;;  %2246 = vst [vmem:[#allocation23_spill] sm:$0xff] %v1437_v46 }
  0x42   :  { %1006 = vpow2.f32 %v278_v15  ;;  %v1420_v15 = vsub.f32 %v180_v43, %v184_v44  ;;  %2242 = vst [vmem:[#allocation19_spill] sm:$0xff] %v1425_v28  ;;  %2243 = vst [vmem:[#allocation20_spill] sm:$0xff] %v1427_v20  ;;  %v290_v43 = vmax.f32 %v1306_v32, 0.0  ;;  %v292_v48 = vmax.f32 %v1345_v56, 0.0 }
  0x43   :  { %1008 = vrcp.f32 %v173_v18  ;;  %2240 = vst [vmem:[#allocation17_spill] sm:$0xff] %v1416_v6  ;;  %v294_v55 = vmul.f32 %v1429_v36, %v1306_v32  ;;  %vm207_vm6 = vcmp.ge.f32.partialorder %v1298_v14, 0.0  ;;  %v296_v54 = vmul.f32 %v1437_v46, %v1345_v56 }
  0x44   :  { %v991_v45 = vpop.eup %990  ;;  %1010 = vrcp.f32 %v174_v22  ;;  %2241 = vst [vmem:[#allocation18_spill] sm:$0xff] %v1420_v15  ;;  %vm208_vm7 = vcmp.ge.f32.partialorder %v1300_v16, 0.0  ;;  %v1461_v46 = vadd.f32 0.75, %v235_v7  ;;  %v1464_v3 = vadd.f32 0.75, %v236_v24  ;;  %v1525_v16 = vld [vmem:[#allocation2 + $0x70] sm:$0xff] }
  0x45   :  { %v993_v51 = vpop.eup %992  ;;  %1012 = vrcp.f32 %v1384_v27  ;;  %v81_v20 = vmul.f32 0.6931472, %v991_v45  ;;  %v284_v0 = vmul.f32 1.442695, %v277_v37  ;;  %vm318_vm8 = vcmp.ge.f32.partialorder %v1306_v32, 0.0 }
  0x46   :  { %v995_v58 = vpop.eup %994  ;;  %1014 = vrcp.f32 %v1391_v31  ;;  %v100_v19 = vmul.f32 %v993_v51, %v1308_v33  ;;  %v1435_v33 = vld [vmem:[#allocation5 + $0x48] sm:$0xff]  ;;  %vm319_vm9 = vcmp.ge.f32.partialorder %v1339_v52, 0.0  ;;  %vm320_vm10 = vcmp.ge.f32.partialorder %v1345_v56, 0.0 }
  0x47   :  { %v997_v8 = vpop.eup %996  ;;  %1016 = vlog2.f32 %v173_v18  ;;  %v291_v18 = vmax.f32 %v1339_v52, 0.0  ;;  %2245 = vst [vmem:[#allocation22_spill] sm:$0xff] %v1435_v33  ;;  %v295_v15 = vmul.f32 %v1435_v33, %v1339_v52  ;;  %v83_v10 = vmul.f32 0.6931472, %v995_v58 }
  0x48   :  { %v999_v29 = vpop.eup %998  ;;  %1018 = vpow2.f32 %v280_v49  ;;  %v293_v49 = vmax.f32 %v1397_v39, 0.0  ;;  %v104_v36 = vsel %vm96_vm0, %v993_v51, %v100_v19  ;;  %v85_v33 = vmul.f32 0.6931472, %v997_v8 }
  0x49   :  { %v1001_v23 = vpop.eup %1000  ;;  %1020 = vpow2.f32 %v282_v57  ;;  %v101_v28 = vmul.f32 %v999_v29, %v1322_v41  ;;  %v1466_v51 = vsub.f32 %v290_v43, %v294_v55  ;;  %v1472_v58 = vsub.f32 %v292_v48, %v296_v54 }
  0x4a   :  { %v1003_v44 = vpop.eup %1002  ;;  %1022 = vlog2.f32 %v174_v22  ;;  %v1445_v22 = vld [vmem:[#allocation5 + $0x58] sm:$0xff]  ;;  %v102_v11 = vmul.f32 %v1001_v23, %v1331_v47  ;;  %v1475_v7 = vadd.f32 %v81_v20, %v1336_v50  ;;  %v1482_v43 = vadd.f32 %v83_v10, %v1348_v59 }
  0x4b   :  { %v1005_v57 = vpop.eup %1004  ;;  %2247 = vst [vmem:[#allocation24_spill] sm:$0xff] %v1445_v22  ;;  %1024 = vlog2.f32 %v1384_v27  ;;  %v297_v41 = vmul.f32 %v1445_v22, %v1397_v39  ;;  %v105_v19 = vsel %vm97_vm1, %v999_v29, %v101_v28  ;;  %v112_v22 = vmul.f32 2.0, %v104_v36 }
  0x4c   :  { %v1451_v40 = vpop.eup %1006  ;;  %1026 = vlog2.f32 %v1391_v31  ;;  %v103_v47 = vmul.f32 %v1005_v57, %v1341_v53  ;;  %v1470_v39 = vsub.f32 %v291_v18, %v295_v15  ;;  %v87_v8 = vmul.f32 0.6931472, %v1003_v44 }
  0x4d   :  { %v1009_v45 = vpop.eup %1008  ;;  %v106_v53 = vsel %vm98_vm2, %v1001_v23, %v102_v11  ;;  %v1479_v24 = vsub.f32 %v293_v49, %v297_v41  ;;  %v1485_v1 = vadd.f32 %v85_v33, %v1350_v60  ;;  %v108_v2 = vadd.f32 %v104_v36, %v1310_v34 }
  0x4e   :  { %v1011_v6 = vpop.eup %1010  ;;  %v209_v54 = vmul.f32 %v1009_v45, %v1352_v61  ;;  %v107_v50 = vsel %vm99_vm3, %v1005_v57, %v103_v47  ;;  %v113_v11 = vmul.f32 2.0, %v105_v19  ;;  %v114_v59 = vmul.f32 2.0, %v106_v53  ;;  %v1518_v47 = vld [vmem:[#allocation2 + $0x60] sm:$0xff] }
  0x4f   :  { %v1013_v27 = vpop.eup %1012  ;;  %v210_v15 = vmul.f32 %v1011_v6, %v1358_v5  ;;  %v116_v60 = vmul.f32 %v112_v22, %v1310_v34  ;;  %1028 = vpow2.f32 %v284_v0  ;;  %v1500_v5 = vadd.f32 %v87_v8, %v1354_v62 }
  0x50   :  { %v1015_v31 = vpop.eup %1014  ;;  %v211_v28 = vmul.f32 %v1013_v27, %v1363_v9  ;;  %v109_v4 = vadd.f32 %v105_v19, %v1312_v35  ;;  %v110_v23 = vadd.f32 %v106_v53, %v1317_v38  ;;  %v286_v36 = vadd.f32 1.0, %v1451_v40 }
  0x51   :  { %v1017_v37 = vpop.eup %1016  ;;  %v212_v10 = vmul.f32 %v1015_v31, %v1369_v17  ;;  %v115_v18 = vmul.f32 2.0, %v107_v50  ;;  %v213_v9 = vsel %vm205_vm4, %v1009_v45, %v209_v54  ;;  %v214_v34 = vsel %vm206_vm5, %v1011_v6, %v210_v15 }
  0x52   :  { %v1489_v29 = vpop.eup %1018  ;;  %v111_v33 = vadd.f32 %v107_v50, %v1324_v42  ;;  %v117_v62 = vmul.f32 %v113_v11, %v1312_v35  ;;  %v215_v48 = vsel %vm207_vm6, %v1013_v27, %v211_v28  ;;  %v118_v57 = vmul.f32 %v114_v59, %v1317_v38  ;;  %v1521_v27 = vld [vmem:[#allocation2 + $0x68] sm:$0xff] }
  0x53   :  { %v1495_v20 = vpop.eup %1020  ;;  %v287_v17 = vadd.f32 1.0, %v1489_v29  ;;  %v120_v12 = vsub.f32 %v108_v2, %v116_v60  ;;  %v190_v22 = vmul.f32 0.6931472, %v1017_v37  ;;  %v216_v13 = vsel %vm208_vm7, %v1015_v31, %v212_v10  ;;  %v1527_v31 = vld [vmem:[#allocation2 + $0x78] sm:$0xff] }
  0x54   :  { %v1023_v61 = vpop.eup %1022  ;;  %v288_v49 = vadd.f32 1.0, %v1495_v20  ;;  %v221_v41 = vmul.f32 2.0, %v213_v9  ;;  %v222_v45 = vmul.f32 2.0, %v214_v34  ;;  %1030 = vrcp.f32 %v286_v36 }
  0x55   :  { %v1025_v44 = vpop.eup %1024  ;;  %v192_v6 = vmul.f32 0.6931472, %v1023_v61  ;;  %v119_v35 = vmul.f32 %v115_v18, %v1324_v42  ;;  %v223_v0 = vmul.f32 2.0, %v215_v48  ;;  %1032 = vrcp.f32 %v287_v17 }
  0x56   :  { %v1027_v55 = vpop.eup %1026  ;;  %v194_v14 = vmul.f32 0.6931472, %v1025_v44  ;;  %v121_v19 = vsub.f32 %v109_v4, %v117_v62  ;;  %v224_v8 = vmul.f32 2.0, %v216_v13  ;;  %1034 = vrcp.f32 %v288_v49 }
  0x57   :  { %v1523_v38 = vmul.f32 0.6931472, %v1027_v55  ;;  %v122_v53 = vsub.f32 %v110_v23, %v118_v57  ;;  %v217_v37 = vadd.f32 %v213_v9, %v1374_v21  ;;  %v218_v54 = vadd.f32 %v214_v34, %v1379_v25 }
  0x58   :  { %v383_v42 = vand.u32 2147483647, %v1518_v47  ;;  %v219_v15 = vadd.f32 %v215_v48, %v1381_v26  ;;  %v225_v50 = vmul.f32 %v221_v41, %v1374_v21  ;;  %v226_v2 = vmul.f32 %v222_v45, %v1379_v25 }
  0x59   :  { %v384_v11 = vand.u32 2147483647, %v1521_v27  ;;  %v1536_v28 = vpop.eup %1028  ;;  %v227_v59 = vmul.f32 %v223_v0, %v1381_v26  ;;  %v385_v60 = vand.u32 2147483647, %v1525_v16  ;;  %v386_v10 = vand.u32 2147483647, %v1527_v31 }
  0x5a   :  { %v387_v61 = vsub.f32 0.0, %v383_v42  ;;  %v123_v4 = vsub.f32 %v111_v33, %v119_v35  ;;  %v220_v23 = vadd.f32 %v216_v13, %v1388_v30  ;;  %v228_v18 = vmul.f32 %v224_v8, %v1388_v30 }
  0x5b   :  { %v1544_v21 = vadd.f32 1.0, %v1536_v28  ;;  %1036 = vlog2.f32 %v286_v36  ;;  %v388_v25 = vsub.f32 0.0, %v384_v11  ;;  %v389_v26 = vsub.f32 0.0, %v385_v60 }
  0x5c   :  { %v390_v9 = vsub.f32 0.0, %v386_v10  ;;  %v229_v34 = vsub.f32 %v217_v37, %v225_v50  ;;  %v230_v44 = vsub.f32 %v218_v54, %v226_v2  ;;  %1038 = vlog2.f32 %v287_v17  ;;  %v2248_v37 = vld [vmem:[#allocation16_spill] sm:$0xff]  ;;  %v2249_v54 = vld [vmem:[#allocation17_spill] sm:$0xff]  ;;  %v2254_v10 = vld [vmem:[#allocation15_spill] sm:$0xff] }
  0x5d   :  { %v391_v33 = vmul.f32 1.442695, %v387_v61  ;;  %v231_v62 = vsub.f32 %v219_v15, %v227_v59  ;;  %1040 = vrcp.f32 %v1544_v21  ;;  %v393_v30 = vmul.f32 1.442695, %v388_v25  ;;  %v2256_v25 = vld [vmem:[#allocation21_spill] sm:$0xff] }
  0x5e   :  { %v395_v48 = vmul.f32 1.442695, %v389_v26  ;;  %v1031_v55 = vpop.eup %1030  ;;  %v132_v36 = vmul.f32 %v120_v12, %v120_v12  ;;  %v197_v57 = vadd.f32 %v190_v22, %v1412_v63  ;;  %1042 = vlog2.f32 %v288_v49  ;;  %v2250_v12 = vld [vmem:[#allocation13_spill] sm:$0xff] }
  0x5f   :  { %v397_v13 = vmul.f32 1.442695, %v390_v9  ;;  %v1033_v41 = vpop.eup %1032  ;;  %v133_v45 = vmul.f32 %v121_v19, %v121_v19  ;;  %v134_v35 = vmul.f32 %v122_v53, %v122_v53  ;;  %v135_v0 = vmul.f32 %v123_v4, %v123_v4  ;;  %v2251_v19 = vld [vmem:[#allocation11_spill] sm:$0xff]  ;;  %v2255_v4 = vld [vmem:[#allocation18_spill] sm:$0xff] }
  0x60   :  { %1044 = vpow2.f32 %v391_v33  ;;  %v1035_v8 = vpop.eup %1034  ;;  %v198_v17 = vadd.f32 %v192_v6, %v2248_v37  ;;  %v199_v42 = vadd.f32 %v194_v14, %v2249_v54  ;;  %v232_v15 = vsub.f32 %v220_v23, %v228_v18  ;;  %v2252_v6 = vld [vmem:[#allocation12_spill] sm:$0xff]  ;;  %v2253_v14 = vld [vmem:[#allocation14_spill] sm:$0xff] }
  0x61   :  { %1046 = vpow2.f32 %v393_v30  ;;  %v241_v50 = vmul.f32 %v229_v34, %v229_v34  ;;  %v242_v2 = vmul.f32 %v230_v44, %v230_v44  ;;  %v243_v11 = vmul.f32 %v231_v62, %v231_v62  ;;  %v2258_v34 = vld [vmem:[#allocation19_spill] sm:$0xff]  ;;  %v2259_v44 = vld [vmem:[#allocation20_spill] sm:$0xff] }
  0x62   :  { %vm321_vm11 = vcmp.ge.f32.partialorder %v2250_v12, 0.0  ;;  %1048 = vpow2.f32 %v395_v48  ;;  %v322_v63 = vmul.f32 %v1031_v55, %v1451_v40  ;;  %v323_v49 = vmul.f32 %v1033_v41, %v1489_v29  ;;  %v2257_v40 = vld [vmem:[#allocation22_spill] sm:$0xff]  ;;  %v2260_v62 = vld [vmem:[#allocation23_spill] sm:$0xff]  ;;  %v2261_v48 = vld [vmem:[#allocation24_spill] sm:$0xff] }
  0x63   :  { %v324_v22 = vmul.f32 %v1035_v8, %v1495_v20  ;;  %1050 = vpow2.f32 %v397_v13  ;;  %v136_v53 = vmul.f32 %v132_v36, %v2251_v19  ;;  %v137_v59 = vmul.f32 %v133_v45, %v2252_v6 }
  0x64   :  { %v138_v60 = vmul.f32 %v134_v35, %v2253_v14  ;;  %v139_v61 = vmul.f32 %v135_v0, %v2254_v10  ;;  %v200_v23 = vadd.f32 %v1523_v38, %v2255_v4  ;;  %v244_v18 = vmul.f32 %v232_v15, %v232_v15 }
  0x65   :  { %v346_v26 = vmul.f32 -0.5, %v2256_v25  ;;  %v347_v9 = vmul.f32 -0.5, %v2257_v40  ;;  %v1037_v29 = vpop.eup %1036  ;;  %v245_v20 = vmul.f32 %v241_v50, %v2258_v34  ;;  %v246_v33 = vmul.f32 %v242_v2, %v2259_v44  ;;  %v1630_v34 = vld [vmem:[#allocation2 + $0x88] sm:$0xff] }
  0x66   :  { %v348_v30 = vmul.f32 -0.5, %v2260_v62  ;;  %v349_v36 = vmul.f32 -0.5, %v2261_v48  ;;  %v1039_v13 = vpop.eup %1038  ;;  %v247_v45 = vmul.f32 %v243_v11, %v1461_v46  ;;  %v326_v38 = vsel %vm318_vm8, %v1031_v55, %v322_v63 }
  0x67   :  { %v327_v35 = vsel %vm319_vm9, %v1033_v41, %v323_v49  ;;  %v328_v0 = vsel %vm320_vm10, %v1035_v8, %v324_v22  ;;  %v1041_v37 = vpop.eup %1040  ;;  %v140_v54 = vmul.f32 %v136_v53, %v1475_v7  ;;  %v141_v15 = vmul.f32 %v137_v59, %v1482_v43 }
  0x68   :  { %v1579_v50 = vmul.f32 %v138_v60, %v1485_v1  ;;  %v1582_v2 = vmul.f32 %v139_v61, %v1500_v5  ;;  %v1043_v46 = vpop.eup %1042  ;;  %v248_v32 = vmul.f32 %v244_v18, %v1464_v3  ;;  %v325_v52 = vmul.f32 %v1041_v37, %v1536_v28 }
  0x69   :  { %v1586_v55 = vadd.f32 0.75, %v346_v26  ;;  %v1588_v56 = vadd.f32 0.75, %v347_v9  ;;  %v334_v7 = vmul.f32 2.0, %v326_v38  ;;  %v335_v8 = vmul.f32 2.0, %v327_v35  ;;  %v1624_v26 = vld [vmem:[#allocation2 + $0x80] sm:$0xff] }
  0x6a   :  { %v1590_v41 = vpop.eup %1044  ;;  %v336_v43 = vmul.f32 2.0, %v328_v0  ;;  %v1592_v11 = vadd.f32 0.75, %v348_v30  ;;  %v249_v5 = vmul.f32 %v245_v20, %v197_v57  ;;  %v250_v63 = vmul.f32 %v246_v33, %v198_v17  ;;  %v1639_v33 = vld [vmem:[#allocation2 + $0x90] sm:$0xff] }
  0x6b   :  { %v1594_v1 = vpop.eup %1046  ;;  %v1596_v49 = vmul.f32 %v247_v45, %v199_v42  ;;  %v1598_v3 = vadd.f32 0.75, %v349_v36  ;;  %v303_v22 = vmul.f32 0.6931472, %v1037_v29  ;;  %v305_v19 = vmul.f32 0.6931472, %v1039_v13 }
  0x6c   :  { %v1600_v28 = vpop.eup %1048  ;;  %1052 = vlog2.f32 %v1544_v21  ;;  %v330_v53 = vadd.f32 %v326_v38, %v2256_v25  ;;  %v329_v59 = vsel %vm321_vm11, %v1041_v37, %v325_v52  ;;  %v331_v57 = vadd.f32 %v327_v35, %v2257_v40 }
  0x6d   :  { %v1604_v6 = vpop.eup %1050  ;;  %v332_v17 = vadd.f32 %v328_v0, %v2260_v62  ;;  %v399_v42 = vadd.f32 1.0, %v1590_v41  ;;  %v338_v14 = vmul.f32 %v334_v7, %v2256_v25  ;;  %v339_v60 = vmul.f32 %v335_v8, %v2257_v40 }
  0x6e   :  { %v340_v10 = vmul.f32 %v336_v43, %v2260_v62  ;;  %v400_v21 = vadd.f32 1.0, %v1594_v1  ;;  %v1615_v61 = vmul.f32 %v248_v32, %v200_v23  ;;  %v1617_v4 = vadd.f32 %v249_v5, %v140_v54  ;;  %v1641_v62 = vld [vmem:[#allocation2 + $0x98] sm:$0xff] }
  0x6f   :  { %v1619_v12 = vadd.f32 %v250_v63, %v141_v15  ;;  %v1622_v18 = vadd.f32 1.0, %v1600_v28  ;;  %v307_v9 = vmul.f32 0.6931472, %v1043_v46  ;;  %v337_v29 = vmul.f32 2.0, %v329_v59  ;;  %v1653_v63 = vld [vmem:[#allocation5 + $0x60] sm:$0xff] }
  0x70   :  { %v1627_v25 = vadd.f32 1.0, %v1604_v6  ;;  %v403_v40 = vmax.f32 %v1518_v47, 0.0  ;;  %v1633_v23 = vadd.f32 %v303_v22, %v1466_v51  ;;  %v1636_v20 = vadd.f32 %v305_v19, %v1470_v39 }
  0x71   :  { %v404_v44 = vmax.f32 %v1521_v27, 0.0  ;;  %1054 = vrcp.f32 %v399_v42  ;;  %v342_v30 = vsub.f32 %v330_v53, %v338_v14  ;;  %v343_v36 = vsub.f32 %v331_v57, %v339_v60  ;;  %v1655_v53 = vld [vmem:[#allocation5 + $0x68] sm:$0xff]  ;;  %v1659_v14 = vld [vmem:[#allocation5 + $0x78] sm:$0xff] }
  0x72   :  { %v344_v13 = vsub.f32 %v332_v17, %v340_v10  ;;  %1056 = vrcp.f32 %v400_v21  ;;  %v333_v45 = vadd.f32 %v329_v59, %v2261_v48  ;;  %v496_v51 = vand.u32 2147483647, %v1624_v26  ;;  %v1657_v59 = vld [vmem:[#allocation5 + $0x70] sm:$0xff] }
  0x73   :  { %1058 = vrcp.f32 %v1622_v18  ;;  %v497_v39 = vand.u32 2147483647, %v1630_v34  ;;  %v341_v38 = vmul.f32 %v337_v29, %v2261_v48  ;;  %v498_v35 = vand.u32 2147483647, %v1639_v33 }
  0x74   :  { %1060 = vrcp.f32 %v1627_v25  ;;  %v499_v0 = vand.u32 2147483647, %v1641_v62  ;;  %v405_v37 = vmax.f32 %v1525_v16, 0.0  ;;  %v406_v54 = vmax.f32 %v1527_v31, 0.0 }
  0x75   :  { %v500_v15 = vsub.f32 0.0, %v496_v51  ;;  %v501_v46 = vsub.f32 0.0, %v497_v39  ;;  %v354_v52 = vmul.f32 %v342_v30, %v342_v30  ;;  %v355_v7 = vmul.f32 %v343_v36, %v343_v36 }
  0x76   :  { %v1053_v32 = vpop.eup %1052  ;;  %v502_v8 = vsub.f32 0.0, %v498_v35  ;;  %v503_v43 = vsub.f32 0.0, %v499_v0  ;;  %v356_v5 = vmul.f32 %v344_v13, %v344_v13  ;;  %1062 = vlog2.f32 %v399_v42 }
  0x77   :  { %v504_v48 = vmul.f32 1.442695, %v500_v15  ;;  %v506_v22 = vmul.f32 1.442695, %v501_v46  ;;  %v345_v19 = vsub.f32 %v333_v45, %v341_v38  ;;  %1064 = vlog2.f32 %v400_v21 }
  0x78   :  { %v508_v57 = vmul.f32 1.442695, %v502_v8  ;;  %v510_v17 = vmul.f32 1.442695, %v503_v43  ;;  %v407_v60 = vmul.f32 %v1653_v63, %v1518_v47  ;;  %v408_v10 = vmul.f32 %v1655_v53, %v1521_v27 }
  0x79   :  { %v409_v42 = vmul.f32 %v1657_v59, %v1525_v16  ;;  %1066 = vpow2.f32 %v504_v48  ;;  %v358_v29 = vmul.f32 %v354_v52, %v1586_v55  ;;  %v359_v30 = vmul.f32 %v355_v7, %v1588_v56 }
  0x7a   :  { %v410_v21 = vmul.f32 %v1659_v14, %v1527_v31  ;;  %1068 = vpow2.f32 %v506_v22  ;;  %v309_v13 = vmul.f32 0.6931472, %v1053_v32  ;;  %v312_v45 = vadd.f32 %v307_v9, %v1472_v58 }
  0x7b   :  { %v1055_v36 = vpop.eup %1054  ;;  %v360_v51 = vmul.f32 %v356_v5, %v1592_v11  ;;  %1070 = vpow2.f32 %v508_v57  ;;  %v255_v38 = vadd.f32 %v1596_v49, %v1579_v50  ;;  %v256_v55 = vadd.f32 %v1615_v61, %v1582_v2 }
  0x7c   :  { %v1057_v39 = vpop.eup %1056  ;;  %v357_v35 = vmul.f32 %v345_v19, %v345_v19  ;;  %1072 = vpow2.f32 %v510_v17  ;;  %v1677_v0 = vsub.f32 %v403_v40, %v407_v60  ;;  %v1679_v15 = vsub.f32 %v404_v44, %v408_v10  ;;  %v1738_v10 = vld [vmem:[#allocation5 + $0x80] sm:$0xff] }
  0x7d   :  { %v1059_v56 = vpop.eup %1058  ;;  %v1681_v46 = vsub.f32 %v405_v37, %v409_v42  ;;  %vm431_vm12 = vcmp.ge.f32.partialorder %v1518_v47, 0.0  ;;  %v362_v11 = vmul.f32 %v358_v29, %v1633_v23  ;;  %v363_v9 = vmul.f32 %v359_v30, %v1636_v20 }
  0x7e   :  { %v1061_v58 = vpop.eup %1060  ;;  %v1686_v50 = vsub.f32 %v406_v54, %v410_v21  ;;  %vm432_vm13 = vcmp.ge.f32.partialorder %v1521_v27, 0.0  ;;  %v313_v2 = vadd.f32 %v309_v13, %v1479_v24  ;;  %v364_v49 = vmul.f32 %v360_v51, %v312_v45 }
  0x7f   :  { %v435_v61 = vmul.f32 %v1055_v36, %v1590_v41  ;;  %v436_v40 = vmul.f32 %v1057_v39, %v1594_v1  ;;  %v361_v44 = vmul.f32 %v357_v35, %v1598_v3  ;;  %v437_v37 = vmul.f32 %v1059_v56, %v1600_v28 }
  0x80   :  { %v459_v32 = vmul.f32 -0.5, %v1653_v63  ;;  %v460_v23 = vmul.f32 -0.5, %v1655_v53  ;;  %v1063_v20 = vpop.eup %1062  ;;  %vm433_vm14 = vcmp.ge.f32.partialorder %v1525_v16, 0.0  ;;  %v438_v54 = vmul.f32 %v1061_v58, %v1604_v6 }
  0x81   :  { %v461_v24 = vmul.f32 -0.5, %v1657_v59  ;;  %v462_v52 = vmul.f32 -0.5, %v1659_v14  ;;  %v1065_v41 = vpop.eup %1064  ;;  %v1701_v1 = vadd.f32 %v362_v11, %v1617_v4  ;;  %v1704_v3 = vadd.f32 %v363_v9, %v1619_v12  ;;  %v1761_v9 = vld [vmem:[#allocation5 + $0x88] sm:$0xff] }
  0x82   :  { %1074 = vlog2.f32 %v1622_v18  ;;  %vm434_vm15 = vcmp.ge.f32.partialorder %v1527_v31, 0.0  ;;  %v1710_v7 = vadd.f32 %v364_v49, %v255_v38  ;;  %v439_v6 = vsel %vm431_vm12, %v1055_v36, %v435_v61  ;;  %v1766_v49 = vld [vmem:[#allocation2 + $0xb0] sm:$0xff] }
  0x83   :  { %v1708_v28 = vpop.eup %1066  ;;  %1076 = vlog2.f32 %v1627_v25  ;;  %v440_v4 = vsel %vm432_vm13, %v1057_v39, %v436_v40  ;;  %v365_v12 = vmul.f32 %v361_v44, %v313_v2  ;;  %v441_v18 = vsel %vm433_vm14, %v1059_v56, %v437_v37  ;;  %v1756_v56 = vld [vmem:[#allocation2 + $0xa0] sm:$0xff]  ;;  %v1764_v2 = vld [vmem:[#allocation2 + $0xa8] sm:$0xff] }
  0x84   :  { %v1717_v8 = vpop.eup %1068  ;;  %v1721_v43 = vadd.f32 0.75, %v459_v32  ;;  %v1723_v31 = vadd.f32 0.75, %v460_v23  ;;  %v442_v48 = vsel %vm434_vm15, %v1061_v58, %v438_v54  ;;  %v1727_v25 = vadd.f32 0.75, %v461_v24  ;;  %v1777_v23 = vld [vmem:[#allocation5 + $0x90] sm:$0xff] }
  0x85   :  { %v1725_v5 = vpop.eup %1070  ;;  %v1729_v47 = vadd.f32 0.75, %v462_v52  ;;  %v447_v19 = vmul.f32 2.0, %v439_v6  ;;  %v448_v57 = vmul.f32 2.0, %v440_v4  ;;  %v1735_v16 = vadd.f32 1.0, %v1708_v28 }
  0x86   :  { %v1732_v22 = vpop.eup %1072  ;;  %v449_v60 = vmul.f32 2.0, %v441_v18  ;;  %v1741_v42 = vadd.f32 1.0, %v1717_v8  ;;  %v1745_v21 = vadd.f32 %v365_v12, %v256_v55  ;;  %v450_v36 = vmul.f32 2.0, %v442_v48 }
  0x87   :  { %v1748_v13 = vadd.f32 1.0, %v1725_v5  ;;  %v520_v45 = vmul.f32 %v1738_v10, %v1624_v26  ;;  %v416_v51 = vmul.f32 0.6931472, %v1063_v20  ;;  %v418_v39 = vmul.f32 0.6931472, %v1065_v41 }
  0x88   :  { %v443_v38 = vadd.f32 %v439_v6, %v1653_v63  ;;  %v1754_v35 = vadd.f32 1.0, %v1732_v22  ;;  %v444_v58 = vadd.f32 %v440_v4, %v1655_v53  ;;  %v451_v55 = vmul.f32 %v447_v19, %v1653_v63  ;;  %v1773_v63 = vld [vmem:[#allocation2 + $0xb8] sm:$0xff] }
  0x89   :  { %v452_v11 = vmul.f32 %v448_v57, %v1655_v53  ;;  %1078 = vrcp.f32 %v1735_v16  ;;  %v445_v61 = vadd.f32 %v441_v18, %v1657_v59  ;;  %v453_v40 = vmul.f32 %v449_v60, %v1657_v59 }
  0x8a   :  { %v521_v44 = vmul.f32 %v1761_v9, %v1630_v34  ;;  %1080 = vrcp.f32 %v1741_v42  ;;  %v446_v37 = vadd.f32 %v442_v48, %v1659_v14  ;;  %v454_v32 = vmul.f32 %v450_v36, %v1659_v14  ;;  %v1787_v36 = vld [vmem:[#allocation5 + $0x98] sm:$0xff] }
  0x8b   :  { %1082 = vrcp.f32 %v1748_v13  ;;  %v609_v20 = vand.u32 2147483647, %v1756_v56  ;;  %v522_v59 = vmul.f32 %v1777_v23, %v1639_v33  ;;  %v610_v24 = vand.u32 2147483647, %v1764_v2 }
  0x8c   :  { %v1075_v53 = vpop.eup %1074  ;;  %1084 = vrcp.f32 %v1754_v35  ;;  %v611_v52 = vand.u32 2147483647, %v1766_v49  ;;  %v455_v41 = vsub.f32 %v443_v38, %v451_v55  ;;  %v456_v6 = vsub.f32 %v444_v58, %v452_v11 }
  0x8d   :  { %v1077_v54 = vpop.eup %1076  ;;  %v612_v14 = vand.u32 2147483647, %v1773_v63  ;;  %v613_v4 = vsub.f32 0.0, %v609_v20  ;;  %v420_v12 = vmul.f32 0.6931472, %v1075_v53  ;;  %v457_v18 = vsub.f32 %v445_v61, %v453_v40 }
  0x8e   :  { %v614_v48 = vsub.f32 0.0, %v610_v24  ;;  %v615_v19 = vsub.f32 0.0, %v611_v52  ;;  %v422_v57 = vmul.f32 0.6931472, %v1077_v54  ;;  %v458_v60 = vsub.f32 %v446_v37, %v454_v32 }
  0x8f   :  { %v616_v30 = vsub.f32 0.0, %v612_v14  ;;  %v617_v29 = vmul.f32 1.442695, %v613_v4  ;;  %v423_v17 = vadd.f32 %v416_v51, %v1677_v0  ;;  %v523_v27 = vmul.f32 %v1787_v36, %v1641_v62 }
  0x90   :  { %v619_v38 = vmul.f32 1.442695, %v614_v48  ;;  %v621_v58 = vmul.f32 1.442695, %v615_v19  ;;  %v424_v55 = vadd.f32 %v418_v39, %v1679_v15  ;;  %v467_v11 = vmul.f32 %v455_v41, %v455_v41 }
  0x91   :  { %v468_v53 = vmul.f32 %v456_v6, %v456_v6  ;;  %1086 = vpow2.f32 %v617_v29  ;;  %v469_v61 = vmul.f32 %v457_v18, %v457_v18  ;;  %v2262_v40 = vmax.f32 %v1624_v26, 0.0 }
  0x92   :  { %1088 = vpow2.f32 %v619_v38  ;;  %v623_v32 = vmul.f32 1.442695, %v616_v30  ;;  %v425_v0 = vadd.f32 %v420_v12, %v1681_v46  ;;  %v426_v51 = vadd.f32 %v422_v57, %v1686_v50 }
  0x93   :  { %v1795_v37 = vsub.f32 %v2262_v40, %v520_v45  ;;  %v1079_v20 = vpop.eup %1078  ;;  %v470_v54 = vmul.f32 %v458_v60, %v458_v60  ;;  %v2263_v24 = vmax.f32 %v1630_v34, 0.0  ;;  %v2264_v29 = vmax.f32 %v1639_v33, 0.0 }
  0x94   :  { %v1081_v15 = vpop.eup %1080  ;;  %vm544_vm0 = vcmp.ge.f32.partialorder %v1624_v26, 0.0  ;;  %vm545_vm1 = vcmp.ge.f32.partialorder %v1630_v34, 0.0  ;;  %1090 = vpow2.f32 %v621_v58  ;;  %v471_v46 = vmul.f32 %v467_v11, %v1721_v43 }
  0x95   :  { %v1801_v52 = vsub.f32 %v2263_v24, %v521_v44  ;;  %v1805_v39 = vsub.f32 %v2264_v29, %v522_v59  ;;  %v1083_v30 = vpop.eup %1082  ;;  %v472_v50 = vmul.f32 %v468_v53, %v1723_v31  ;;  %1092 = vlog2.f32 %v1735_v16 }
  0x96   :  { %v548_v45 = vmul.f32 %v1079_v20, %v1708_v28  ;;  %v1085_v44 = vpop.eup %1084  ;;  %v473_v41 = vmul.f32 %v469_v61, %v1727_v25  ;;  %vm546_vm2 = vcmp.ge.f32.partialorder %v1639_v33, 0.0  ;;  %v549_v59 = vmul.f32 %v1081_v15, %v1717_v8 }
  0x97   :  { %1094 = vpow2.f32 %v623_v32  ;;  %v474_v6 = vmul.f32 %v470_v54, %v1729_v47  ;;  %v550_v43 = vmul.f32 %v1083_v30, %v1725_v5  ;;  %v551_v31 = vmul.f32 %v1085_v44, %v1732_v22 }
  0x98   :  { %1096 = vlog2.f32 %v1741_v42  ;;  %vm547_vm3 = vcmp.ge.f32.partialorder %v1641_v62, 0.0  ;;  %v572_v28 = vmul.f32 -0.5, %v1738_v10  ;;  %v573_v16 = vmul.f32 -0.5, %v1761_v9 }
  0x99   :  { %v574_v25 = vmul.f32 -0.5, %v1777_v23  ;;  %v475_v14 = vmul.f32 %v471_v46, %v423_v17  ;;  %v476_v4 = vmul.f32 %v472_v50, %v424_v55  ;;  %v552_v8 = vsel %vm544_vm0, %v1079_v20, %v548_v45  ;;  %v1886_v50 = vld [vmem:[#allocation2 + $0xc0] sm:$0xff] }
  0x9a   :  { %v575_v47 = vmul.f32 -0.5, %v1787_v36  ;;  %v477_v42 = vmul.f32 %v473_v41, %v425_v0  ;;  %v2265_v5 = vmax.f32 %v1641_v62, 0.0  ;;  %1098 = vlog2.f32 %v1748_v13  ;;  %v1891_v41 = vld [vmem:[#allocation5 + $0xa8] sm:$0xff] }
  0x9b   :  { %v553_v22 = vsel %vm545_vm1, %v1081_v15, %v549_v59  ;;  %v1834_v18 = vpop.eup %1086  ;;  %v478_v48 = vmul.f32 %v474_v6, %v426_v51  ;;  %1100 = vlog2.f32 %v1754_v35  ;;  %v554_v26 = vsel %vm546_vm2, %v1083_v30, %v550_v43  ;;  %v1893_v59 = vld [vmem:[#allocation2 + $0xc8] sm:$0xff]  ;;  %v1895_v6 = vld [vmem:[#allocation2 + $0xd0] sm:$0xff] }
  0x9c   :  { %v1829_v12 = vsub.f32 %v2265_v5, %v523_v27  ;;  %v555_v17 = vsel %vm547_vm3, %v1085_v44, %v551_v31  ;;  %v1841_v19 = vpop.eup %1088  ;;  %v560_v27 = vmul.f32 2.0, %v552_v8  ;;  %v1843_v57 = vadd.f32 0.75, %v572_v28 }
  0x9d   :  { %v1845_v13 = vadd.f32 0.75, %v573_v16  ;;  %v1847_v34 = vadd.f32 0.75, %v574_v25  ;;  %v1850_v60 = vadd.f32 %v475_v14, %v1701_v1  ;;  %v1853_v35 = vadd.f32 %v476_v4, %v1704_v3  ;;  %v1866_v1 = vld [vmem:[#allocation5 + $0xa0] sm:$0xff] }
  0x9e   :  { %v561_v33 = vmul.f32 2.0, %v553_v22  ;;  %v1855_v38 = vadd.f32 0.75, %v575_v47  ;;  %v1857_v62 = vpop.eup %1090  ;;  %v1860_v58 = vadd.f32 %v477_v42, %v1710_v7  ;;  %v562_v55 = vmul.f32 2.0, %v554_v26 }
  0x9f   :  { %v563_v11 = vmul.f32 2.0, %v555_v17  ;;  %v625_v53 = vadd.f32 1.0, %v1834_v18  ;;  %v1093_v61 = vpop.eup %1092  ;;  %v1864_v40 = vadd.f32 %v478_v48, %v1745_v21  ;;  %v1869_v3 = vadd.f32 1.0, %v1841_v19 }
  0xa0   :  { %v629_v32 = vmax.f32 %v1756_v56, 0.0  ;;  %v556_v7 = vadd.f32 %v552_v8, %v1738_v10  ;;  %v564_v51 = vmul.f32 %v560_v27, %v1738_v10  ;;  %v633_v21 = vmul.f32 %v1866_v1, %v1756_v56 }
  0xa1   :  { %v1873_v0 = vpop.eup %1094  ;;  %v557_v15 = vadd.f32 %v553_v22, %v1761_v9  ;;  %v558_v29 = vadd.f32 %v554_v26, %v1777_v23  ;;  %v565_v30 = vmul.f32 %v561_v33, %v1761_v9  ;;  %v1884_v46 = vadd.f32 1.0, %v1857_v62  ;;  %v1897_v9 = vld [vmem:[#allocation5 + $0xb0] sm:$0xff] }
  0xa2   :  { %v1097_v24 = vpop.eup %1096  ;;  %v559_v45 = vadd.f32 %v555_v17, %v1787_v36  ;;  %v566_v10 = vmul.f32 %v562_v55, %v1777_v23  ;;  %v567_v44 = vmul.f32 %v563_v11, %v1787_v36  ;;  %1102 = vrcp.f32 %v625_v53  ;;  %v1905_v23 = vld [vmem:[#allocation2 + $0xd8] sm:$0xff] }
  0xa3   :  { %v529_v43 = vmul.f32 0.6931472, %v1093_v61  ;;  %v1900_v31 = vadd.f32 1.0, %v1873_v0  ;;  %v634_v28 = vmul.f32 %v1891_v41, %v1764_v2  ;;  %1104 = vrcp.f32 %v1869_v3 }
  0xa4   :  { %v1099_v36 = vpop.eup %1098  ;;  %v531_v16 = vmul.f32 0.6931472, %v1097_v24  ;;  %v568_v25 = vsub.f32 %v556_v7, %v564_v51  ;;  %v635_v14 = vmul.f32 %v1897_v9, %v1766_v49  ;;  %v722_v4 = vand.u32 2147483647, %v1886_v50 }
  0xa5   :  { %v1101_v8 = vpop.eup %1100  ;;  %v569_v47 = vsub.f32 %v557_v15, %v565_v30  ;;  %1106 = vrcp.f32 %v1884_v46  ;;  %v723_v42 = vand.u32 2147483647, %v1893_v59  ;;  %v724_v5 = vand.u32 2147483647, %v1895_v6 }
  0xa6   :  { %v570_v22 = vsub.f32 %v558_v29, %v566_v10  ;;  %v571_v48 = vsub.f32 %v559_v45, %v567_v44  ;;  %v725_v26 = vand.u32 2147483647, %v1905_v23  ;;  %v726_v17 = vsub.f32 0.0, %v722_v4  ;;  %v1915_v29 = vld [vmem:[#allocation5 + $0xb8] sm:$0xff] }
  0xa7   :  { %v533_v27 = vmul.f32 0.6931472, %v1099_v36  ;;  %1108 = vrcp.f32 %v1900_v31  ;;  %v727_v33 = vsub.f32 0.0, %v723_v42  ;;  %v728_v55 = vsub.f32 0.0, %v724_v5 }
  0xa8   :  { %v535_v11 = vmul.f32 0.6931472, %v1101_v8  ;;  %v580_v61 = vmul.f32 %v568_v25, %v568_v25  ;;  %v729_v7 = vsub.f32 0.0, %v725_v26  ;;  %v730_v51 = vmul.f32 1.442695, %v726_v17 }
  0xa9   :  { %v581_v24 = vmul.f32 %v569_v47, %v569_v47  ;;  %1110 = vlog2.f32 %v625_v53  ;;  %v732_v15 = vmul.f32 1.442695, %v727_v33  ;;  %v734_v30 = vmul.f32 1.442695, %v728_v55 }
  0xaa   :  { %v582_v54 = vmul.f32 %v570_v22, %v570_v22  ;;  %v583_v20 = vmul.f32 %v571_v48, %v571_v48  ;;  %1112 = vpow2.f32 %v730_v51  ;;  %v736_v45 = vmul.f32 1.442695, %v729_v7 }
  0xab   :  { %v536_v10 = vadd.f32 %v529_v43, %v1795_v37  ;;  %v632_v44 = vmax.f32 %v1773_v63, 0.0  ;;  %v636_v36 = vmul.f32 %v1915_v29, %v1773_v63  ;;  %1114 = vpow2.f32 %v732_v15 }
  0xac   :  { %v1103_v25 = vpop.eup %1102  ;;  %v537_v4 = vadd.f32 %v531_v16, %v1801_v52  ;;  %v538_v53 = vadd.f32 %v533_v27, %v1805_v39  ;;  %v1925_v8 = vsub.f32 %v629_v32, %v633_v21  ;;  %1116 = vpow2.f32 %v734_v30 }
  0xad   :  { %v1105_v47 = vpop.eup %1104  ;;  %v584_v42 = vmul.f32 %v580_v61, %v1843_v57  ;;  %v585_v37 = vmul.f32 %v581_v24, %v1845_v13  ;;  %v2266_v43 = vmax.f32 %v1764_v2, 0.0  ;;  %1118 = vpow2.f32 %v736_v45 }
  0xae   :  { %v539_v22 = vadd.f32 %v535_v11, %v1829_v12  ;;  %v586_v52 = vmul.f32 %v582_v54, %v1847_v34  ;;  %v587_v39 = vmul.f32 %v583_v20, %v1855_v38  ;;  %v2267_v32 = vmax.f32 %v1766_v49, 0.0 }
  0xaf   :  { %v1931_v5 = vsub.f32 %v2266_v43, %v634_v28  ;;  %v1107_v16 = vpop.eup %1106  ;;  %v1940_v48 = vsub.f32 %v632_v44, %v636_v36  ;;  %1120 = vlog2.f32 %v1869_v3  ;;  %vm657_vm4 = vcmp.ge.f32.partialorder %v1756_v56, 0.0  ;;  %v1998_v44 = vld [vmem:[#allocation5 + $0xc0] sm:$0xff] }
  0xb0   :  { %v1938_v21 = vsub.f32 %v2267_v32, %v635_v14  ;;  %v661_v57 = vmul.f32 %v1103_v25, %v1834_v18  ;;  %vm658_vm5 = vcmp.ge.f32.partialorder %v1764_v2, 0.0  ;;  %v662_v12 = vmul.f32 %v1105_v47, %v1841_v19 }
  0xb1   :  { %v685_v13 = vmul.f32 -0.5, %v1866_v1  ;;  %v686_v34 = vmul.f32 -0.5, %v1891_v41  ;;  %v1109_v38 = vpop.eup %1108  ;;  %v588_v20 = vmul.f32 %v584_v42, %v536_v10  ;;  %v589_v54 = vmul.f32 %v585_v37, %v537_v4 }
  0xb2   :  { %v687_v28 = vmul.f32 -0.5, %v1897_v9  ;;  %v688_v14 = vmul.f32 -0.5, %v1915_v29  ;;  %v590_v3 = vmul.f32 %v586_v52, %v538_v53  ;;  %v591_v26 = vmul.f32 %v587_v39, %v539_v22  ;;  %v2023_v39 = vld [vmem:[#allocation2 + $0xe0] sm:$0xff] }
  0xb3   :  { %1122 = vlog2.f32 %v1884_v46  ;;  %v663_v18 = vmul.f32 %v1107_v16, %v1857_v62  ;;  %v1111_v17 = vpop.eup %1110  ;;  %vm659_vm6 = vcmp.ge.f32.partialorder %v1766_v49, 0.0  ;;  %vm660_vm7 = vcmp.ge.f32.partialorder %v1773_v63, 0.0 }
  0xb4   :  { %1124 = vlog2.f32 %v1900_v31  ;;  %v665_v19 = vsel %vm657_vm4, %v1103_v25, %v661_v57  ;;  %v1958_v27 = vpop.eup %1112  ;;  %v664_v33 = vmul.f32 %v1109_v38, %v1873_v0  ;;  %v666_v55 = vsel %vm658_vm5, %v1105_v47, %v662_v12  ;;  %v2005_v47 = vld [vmem:[#allocation5 + $0xc8] sm:$0xff]  ;;  %v2027_v12 = vld [vmem:[#allocation5 + $0xd0] sm:$0xff] }
  0xb5   :  { %v1963_v46 = vadd.f32 0.75, %v685_v13  ;;  %v1965_v62 = vadd.f32 0.75, %v686_v34  ;;  %v1967_v11 = vpop.eup %1114  ;;  %v1970_v31 = vadd.f32 %v588_v20, %v1850_v60  ;;  %v1973_v61 = vadd.f32 %v589_v54, %v1853_v35  ;;  %v2030_v13 = vld [vmem:[#allocation2 + $0xe8] sm:$0xff] }
  0xb6   :  { %v1975_v56 = vadd.f32 0.75, %v687_v28  ;;  %v1977_v7 = vadd.f32 0.75, %v688_v14  ;;  %v1979_v0 = vpop.eup %1116  ;;  %v1982_v2 = vadd.f32 %v590_v3, %v1860_v58  ;;  %v1985_v51 = vadd.f32 %v591_v26, %v1864_v40  ;;  %v2040_v28 = vld [vmem:[#allocation2 + $0xf8] sm:$0xff] }
  0xb7   :  { %v667_v24 = vsel %vm659_vm6, %v1107_v16, %v663_v18  ;;  %v673_v60 = vmul.f32 2.0, %v665_v19  ;;  %v1989_v15 = vpop.eup %1118  ;;  %v674_v35 = vmul.f32 2.0, %v666_v55  ;;  %v1992_v30 = vadd.f32 1.0, %v1958_v27 }
  0xb8   :  { %2268 = vst [vmem:[#allocation16_spill] sm:$0xff] %v1985_v51  ;;  %v668_v58 = vsel %vm660_vm7, %v1109_v38, %v664_v33  ;;  %v2001_v40 = vadd.f32 1.0, %v1967_v11  ;;  %v642_v4 = vmul.f32 0.6931472, %v1111_v17  ;;  %v675_v53 = vmul.f32 2.0, %v667_v24 }
  0xb9   :  { %v1121_v25 = vpop.eup %1120  ;;  %v2008_v42 = vadd.f32 1.0, %v1979_v0  ;;  %v2012_v63 = vmul.f32 %v1998_v44, %v1886_v50  ;;  %v669_v37 = vadd.f32 %v665_v19, %v1866_v1  ;;  %v677_v43 = vmul.f32 %v673_v60, %v1866_v1  ;;  %v2032_v1 = vld [vmem:[#allocation2 + $0xf0] sm:$0xff] }
  0xba   :  { %v2017_v22 = vadd.f32 1.0, %v1989_v15  ;;  %v2021_v52 = vmul.f32 %v2005_v47, %v1893_v59  ;;  %v670_v32 = vadd.f32 %v666_v55, %v1891_v41  ;;  %v676_v16 = vmul.f32 2.0, %v668_v58 }
  0xbb   :  { %v678_v57 = vmul.f32 %v674_v35, %v1891_v41  ;;  %1126 = vrcp.f32 %v1992_v30  ;;  %v644_v38 = vmul.f32 0.6931472, %v1121_v25  ;;  %v671_v20 = vadd.f32 %v667_v24, %v1897_v9  ;;  %v2050_v24 = vld [vmem:[#allocation5 + $0xd8] sm:$0xff] }
  0xbc   :  { %v2037_v54 = vmul.f32 %v2027_v12, %v1895_v6  ;;  %1128 = vrcp.f32 %v2001_v40  ;;  %v672_v14 = vadd.f32 %v668_v58, %v1915_v29  ;;  %v679_v3 = vmul.f32 %v675_v53, %v1897_v9 }
  0xbd   :  { %v1123_v34 = vpop.eup %1122  ;;  %1130 = vrcp.f32 %v2008_v42  ;;  %v835_v26 = vand.u32 2147483647, %v2023_v39  ;;  %v681_v18 = vsub.f32 %v669_v37, %v677_v43  ;;  %v836_v17 = vand.u32 2147483647, %v2030_v13 }
  0xbe   :  { %v1125_v41 = vpop.eup %1124  ;;  %1132 = vrcp.f32 %v2017_v22  ;;  %v837_v19 = vand.u32 2147483647, %v2032_v1  ;;  %v680_v33 = vmul.f32 %v676_v16, %v1915_v29  ;;  %v682_v55 = vsub.f32 %v670_v32, %v678_v57 }
  0xbf   :  { %v838_v60 = vand.u32 2147483647, %v2040_v28  ;;  %v839_v35 = vsub.f32 0.0, %v835_v26  ;;  %v646_v9 = vmul.f32 0.6931472, %v1123_v34  ;;  %v840_v25 = vsub.f32 0.0, %v836_v17 }
  0xc0   :  { %v648_v58 = vmul.f32 0.6931472, %v1125_v41  ;;  %v841_v53 = vsub.f32 0.0, %v837_v19  ;;  %v649_v37 = vadd.f32 %v642_v4, %v1925_v8  ;;  %v749_v43 = vmul.f32 %v2050_v24, %v1905_v23 }
  0xc1   :  { %v842_v36 = vsub.f32 0.0, %v838_v60  ;;  %v843_v49 = vmul.f32 1.442695, %v839_v35  ;;  %v683_v10 = vsub.f32 %v671_v20, %v679_v3  ;;  %v693_v45 = vmul.f32 %v681_v18, %v681_v18 }
  0xc2   :  { %v845_v29 = vmul.f32 1.442695, %v840_v25  ;;  %v847_v32 = vmul.f32 1.442695, %v841_v53  ;;  %v684_v16 = vsub.f32 %v672_v14, %v680_v33  ;;  %v694_v57 = vmul.f32 %v682_v55, %v682_v55 }
  0xc3   :  { %1134 = vpow2.f32 %v843_v49  ;;  %v849_v51 = vmul.f32 1.442695, %v842_v36  ;;  %v650_v34 = vadd.f32 %v644_v38, %v1931_v5  ;;  %v651_v41 = vadd.f32 %v646_v9, %v1938_v21 }
  0xc4   :  { %v652_v26 = vadd.f32 %v648_v58, %v1940_v48  ;;  %1136 = vpow2.f32 %v845_v29  ;;  %vm770_vm8 = vcmp.ge.f32.partialorder %v1886_v50, 0.0  ;;  %vm771_vm9 = vcmp.ge.f32.partialorder %v1893_v59, 0.0 }
  0xc5   :  { %v1127_v8 = vpop.eup %1126  ;;  %vm772_vm10 = vcmp.ge.f32.partialorder %v1895_v6, 0.0  ;;  %1138 = vpow2.f32 %v847_v32  ;;  %v695_v20 = vmul.f32 %v683_v10, %v683_v10  ;;  %vm773_vm11 = vcmp.ge.f32.partialorder %v1905_v23, 0.0 }
  0xc6   :  { %v1129_v4 = vpop.eup %1128  ;;  %v774_v49 = vmul.f32 %v1127_v8, %v1958_v27  ;;  %1140 = vpow2.f32 %v849_v51  ;;  %v696_v21 = vmul.f32 %v684_v16, %v684_v16  ;;  %v697_v48 = vmul.f32 %v693_v45, %v1963_v46 }
  0xc7   :  { %v1131_v5 = vpop.eup %1130  ;;  %v698_v36 = vmul.f32 %v694_v57, %v1965_v62  ;;  %v775_v38 = vmul.f32 %v1129_v4, %v1967_v11  ;;  %1142 = vlog2.f32 %v1992_v30  ;;  %v798_v3 = vmul.f32 -0.5, %v1998_v44 }
  0xc8   :  { %v1133_v14 = vpop.eup %1132  ;;  %v799_v10 = vmul.f32 -0.5, %v2005_v47  ;;  %v800_v18 = vmul.f32 -0.5, %v2027_v12  ;;  %1144 = vlog2.f32 %v2001_v40  ;;  %v776_v27 = vmul.f32 %v1131_v5, %v1979_v0 }
  0xc9   :  { %v778_v46 = vsel %vm770_vm8, %v1127_v8, %v774_v49  ;;  %v801_v62 = vmul.f32 -0.5, %v2050_v24  ;;  %v699_v11 = vmul.f32 %v695_v20, %v1975_v56  ;;  %1146 = vlog2.f32 %v2008_v42 }
  0xca   :  { %v777_v51 = vmul.f32 %v1133_v14, %v1989_v15  ;;  %v779_v30 = vsel %vm771_vm9, %v1129_v4, %v775_v38  ;;  %v700_v45 = vmul.f32 %v696_v21, %v1977_v7  ;;  %v701_v17 = vmul.f32 %v697_v48, %v649_v37 }
  0xcb   :  { %v702_v40 = vmul.f32 %v698_v36, %v650_v34  ;;  %1148 = vlog2.f32 %v2017_v22  ;;  %v2269_v0 = vmax.f32 %v1886_v50, 0.0  ;;  %v2270_v56 = vmax.f32 %v1893_v59, 0.0 }
  0xcc   :  { %v2271_v15 = vmax.f32 %v1895_v6, 0.0  ;;  %v786_v7 = vmul.f32 2.0, %v778_v46  ;;  %v2272_v22 = vmax.f32 %v1905_v23, 0.0  ;;  %v780_v50 = vsel %vm772_vm10, %v1131_v5, %v776_v27  ;;  %v2147_v27 = vld [vmem:[#allocation5 + $0xe0] sm:$0xff] }
  0xcd   :  { %v2086_v19 = vsub.f32 %v2269_v0, %v2012_v63  ;;  %v2091_v42 = vsub.f32 %v2270_v56, %v2021_v52  ;;  %v2098_v55 = vpop.eup %1134  ;;  %v787_v63 = vmul.f32 2.0, %v779_v30  ;;  %v2106_v35 = vadd.f32 0.75, %v798_v3  ;;  %v2159_v56 = vld [vmem:[#allocation5 + $0xf8] sm:$0xff] }
  0xce   :  { %v2096_v33 = vsub.f32 %v2271_v15, %v2037_v54  ;;  %v2102_v60 = vsub.f32 %v2272_v22, %v749_v43  ;;  %v2108_v59 = vpop.eup %1136  ;;  %v703_v52 = vmul.f32 %v699_v11, %v651_v41  ;;  %v781_v54 = vsel %vm773_vm11, %v1133_v14, %v777_v51  ;;  %v2149_v11 = vld [vmem:[#allocation5 + $0xe8] sm:$0xff]  ;;  %v2151_v51 = vld [vmem:[#allocation5 + $0xf0] sm:$0xff] }
  0xcf   :  { %v2112_v9 = vadd.f32 0.75, %v799_v10  ;;  %v2114_v58 = vadd.f32 0.75, %v800_v18  ;;  %v2116_v25 = vpop.eup %1138  ;;  %v704_v53 = vmul.f32 %v700_v45, %v652_v26  ;;  %v2119_v37 = vadd.f32 %v701_v17, %v1970_v31 }
  0xd0   :  { %v2122_v6 = vadd.f32 %v702_v40, %v1973_v61  ;;  %v2124_v43 = vadd.f32 0.75, %v801_v62  ;;  %v2126_v29 = vpop.eup %1140  ;;  %v782_v23 = vadd.f32 %v778_v46, %v1998_v44  ;;  %v788_v32 = vmul.f32 2.0, %v780_v50 }
  0xd1   :  { %v790_v16 = vmul.f32 %v786_v7, %v1998_v44  ;;  %v851_v57 = vadd.f32 1.0, %v2098_v55  ;;  %v783_v34 = vadd.f32 %v779_v30, %v2005_v47  ;;  %v789_v41 = vmul.f32 2.0, %v781_v54  ;;  %v1143_v61 = vpop.eup %1142 }
  0xd2   :  { %v791_v31 = vmul.f32 %v787_v63, %v2005_v47  ;;  %v852_v26 = vadd.f32 1.0, %v2108_v59  ;;  %v2135_v8 = vadd.f32 %v703_v52, %v1982_v2  ;;  %v853_v4 = vadd.f32 1.0, %v2116_v25  ;;  %v1145_v44 = vpop.eup %1144 }
  0xd3   :  { %v855_v20 = vmax.f32 %v2023_v39, 0.0  ;;  %v856_v49 = vmax.f32 %v2030_v13, 0.0  ;;  %v854_v5 = vadd.f32 1.0, %v2126_v29  ;;  %v857_v21 = vmax.f32 %v2032_v1, 0.0  ;;  %v1147_v47 = vpop.eup %1146 }
  0xd4   :  { %v858_v48 = vmax.f32 %v2040_v28, 0.0  ;;  %1150 = vlog2.f32 %v851_v57  ;;  %v784_v36 = vadd.f32 %v780_v50, %v2027_v12  ;;  %v792_v2 = vmul.f32 %v788_v32, %v2027_v12  ;;  %v2273_v50 = vld [vmem:[#allocation16_spill] sm:$0xff] }
  0xd5   :  { %v794_v38 = vsub.f32 %v782_v23, %v790_v16  ;;  %1152 = vrcp.f32 %v851_v57  ;;  %v1149_v14 = vpop.eup %1148  ;;  %v785_v3 = vadd.f32 %v781_v54, %v2050_v24  ;;  %v793_v10 = vmul.f32 %v789_v41, %v2050_v24 }
  0xd6   :  { %v795_v18 = vsub.f32 %v783_v34, %v791_v31  ;;  %1154 = vrcp.f32 %v852_v26  ;;  %v755_v46 = vmul.f32 0.6931472, %v1143_v61  ;;  %v757_v62 = vmul.f32 0.6931472, %v1145_v44 }
  0xd7   :  { %v859_v12 = vmul.f32 %v2147_v27, %v2023_v39  ;;  %1156 = vrcp.f32 %v853_v4  ;;  %v759_v30 = vmul.f32 0.6931472, %v1147_v47  ;;  %v860_v45 = vmul.f32 %v2149_v11, %v2030_v13 }
  0xd8   :  { %v861_v24 = vmul.f32 %v2151_v51, %v2032_v1  ;;  %1158 = vrcp.f32 %v854_v5  ;;  %v761_v17 = vmul.f32 0.6931472, %v1149_v14  ;;  %v796_v40 = vsub.f32 %v784_v36, %v792_v2 }
  0xd9   :  { %v806_v0 = vmul.f32 %v794_v38, %v794_v38  ;;  %1160 = vlog2.f32 %v852_v26  ;;  %v797_v15 = vsub.f32 %v785_v3, %v793_v10  ;;  %v807_v7 = vmul.f32 %v795_v18, %v795_v18 }
  0xda   :  { %v862_v22 = vmul.f32 %v2159_v56, %v2040_v28  ;;  %1162 = vlog2.f32 %v853_v4  ;;  %v2164_v63 = vadd.f32 %v704_v53, %v2273_v50  ;;  %v762_v52 = vadd.f32 %v755_v46, %v2086_v19 }
  0xdb   :  { %v763_v54 = vadd.f32 %v757_v62, %v2091_v42  ;;  %1164 = vlog2.f32 %v854_v5  ;;  %v764_v23 = vadd.f32 %v759_v30, %v2096_v33  ;;  %v863_v32 = vsub.f32 %v855_v20, %v859_v12 }
  0xdc   :  { %v2169_v16 = vsub.f32 %v856_v49, %v860_v45  ;;  %v911_v57 = vmul.f32 -0.5, %v2147_v27  ;;  %v765_v34 = vadd.f32 %v761_v17, %v2102_v60  ;;  %v808_v41 = vmul.f32 %v796_v40, %v796_v40 }
  0xdd   :  { %v810_v31 = vmul.f32 %v806_v0, %v2106_v35  ;;  %v912_v53 = vmul.f32 -0.5, %v2149_v11  ;;  %v809_v61 = vmul.f32 %v797_v15, %v797_v15  ;;  %v811_v19 = vmul.f32 %v807_v7, %v2112_v9 }
  0xde   :  { %v1151_v26 = vpop.eup %1150  ;;  %v865_v42 = vsub.f32 %v857_v21, %v861_v24  ;;  %v866_v4 = vsub.f32 %v858_v48, %v862_v22  ;;  %vm883_vm12 = vcmp.ge.f32.partialorder %v2023_v39, 0.0  ;;  %vm884_vm13 = vcmp.ge.f32.partialorder %v2030_v13, 0.0 }
  0xdf   :  { %v1153_v44 = vpop.eup %1152  ;;  %vm885_vm14 = vcmp.ge.f32.partialorder %v2032_v1, 0.0  ;;  %vm886_vm15 = vcmp.ge.f32.partialorder %v2040_v28, 0.0  ;;  %v913_v35 = vmul.f32 -0.5, %v2151_v51  ;;  %v914_v20 = vmul.f32 -0.5, %v2159_v56 }
  0xe0   :  { %v1155_v33 = vpop.eup %1154  ;;  %v887_v60 = vmul.f32 %v1153_v44, %v2098_v55  ;;  %v915_v49 = vadd.f32 0.75, %v911_v57  ;;  %v812_v5 = vmul.f32 %v808_v41, %v2114_v58  ;;  %v814_v21 = vmul.f32 %v810_v31, %v762_v52 }
  0xe1   :  { %v1157_v9 = vpop.eup %1156  ;;  %v888_v48 = vmul.f32 %v1155_v33, %v2108_v59  ;;  %v916_v47 = vadd.f32 0.75, %v912_v53  ;;  %v813_v2 = vmul.f32 %v809_v61, %v2124_v43  ;;  %v815_v38 = vmul.f32 %v811_v19, %v763_v54 }
  0xe2   :  { %v1159_v36 = vpop.eup %1158  ;;  %v889_v14 = vmul.f32 %v1157_v9, %v2116_v25  ;;  %v891_v55 = vsel %vm883_vm12, %v1153_v44, %v887_v60  ;;  %v868_v62 = vmul.f32 0.6931472, %v1151_v26  ;;  %v917_v22 = vadd.f32 0.75, %v913_v35 }
  0xe3   :  { %v1161_v3 = vpop.eup %1160  ;;  %v890_v10 = vmul.f32 %v1159_v36, %v2126_v29  ;;  %v892_v18 = vsel %vm884_vm13, %v1155_v33, %v888_v48  ;;  %v895_v58 = vadd.f32 %v891_v55, %v2147_v27  ;;  %v899_v46 = vmul.f32 2.0, %v891_v55 }
  0xe4   :  { %v1163_v59 = vpop.eup %1162  ;;  %v893_v43 = vsel %vm885_vm14, %v1157_v9, %v889_v14  ;;  %v896_v12 = vadd.f32 %v892_v18, %v2149_v11  ;;  %v900_v25 = vmul.f32 2.0, %v892_v18  ;;  %v870_v24 = vmul.f32 0.6931472, %v1161_v3 }
  0xe5   :  { %v1165_v30 = vpop.eup %1164  ;;  %v894_v39 = vsel %vm886_vm15, %v1159_v36, %v890_v10  ;;  %v897_v29 = vadd.f32 %v893_v43, %v2151_v51  ;;  %v901_v45 = vmul.f32 2.0, %v893_v43  ;;  %v903_v13 = vmul.f32 %v899_v46, %v2147_v27 }
  0xe6   :  { %v898_v17 = vadd.f32 %v894_v39, %v2159_v56  ;;  %v902_v40 = vmul.f32 2.0, %v894_v39  ;;  %v904_v0 = vmul.f32 %v900_v25, %v2149_v11  ;;  %v872_v1 = vmul.f32 0.6931472, %v1163_v59 }
  0xe7   :  { %v905_v15 = vmul.f32 %v901_v45, %v2151_v51  ;;  %v907_v7 = vsub.f32 %v895_v58, %v903_v13  ;;  %v816_v50 = vmul.f32 %v812_v5, %v764_v23  ;;  %v874_v52 = vmul.f32 0.6931472, %v1165_v30 }
  0xe8   :  { %v906_v28 = vmul.f32 %v902_v40, %v2159_v56  ;;  %v908_v54 = vsub.f32 %v896_v12, %v904_v0  ;;  %v875_v57 = vadd.f32 %v868_v62, %v863_v32  ;;  %v918_v31 = vadd.f32 0.75, %v914_v20 }
  0xe9   :  { %v909_v41 = vsub.f32 %v897_v29, %v905_v15  ;;  %v919_v27 = vmul.f32 %v907_v7, %v907_v7  ;;  %v817_v53 = vmul.f32 %v813_v2, %v765_v34  ;;  %v876_v26 = vadd.f32 %v870_v24, %v2169_v16 }
  0xea   :  { %v910_v61 = vsub.f32 %v898_v17, %v906_v28  ;;  %v920_v19 = vmul.f32 %v908_v54, %v908_v54  ;;  %v818_v11 = vadd.f32 %v814_v21, %v2119_v37  ;;  %v877_v44 = vadd.f32 %v872_v1, %v865_v42 }
  0xeb   :  { %v921_v51 = vmul.f32 %v909_v41, %v909_v41  ;;  %v923_v33 = vmul.f32 %v919_v27, %v915_v49  ;;  %v819_v23 = vadd.f32 %v815_v38, %v2122_v6  ;;  %v878_v60 = vadd.f32 %v874_v52, %v866_v4 }
  0xec   :  { %v922_v35 = vmul.f32 %v910_v61, %v910_v61  ;;  %v924_v56 = vmul.f32 %v920_v19, %v916_v47  ;;  %v820_v32 = vadd.f32 %v816_v50, %v2135_v8  ;;  %v821_v34 = vadd.f32 %v817_v53, %v2164_v63 }
  0xed   :  { %v925_v9 = vmul.f32 %v921_v51, %v917_v22  ;;  %v927_v20 = vmul.f32 %v923_v33, %v875_v57 }
  0xee   :  { %v926_v5 = vmul.f32 %v922_v35, %v918_v31  ;;  %v928_v16 = vmul.f32 %v924_v56, %v876_v26 }
  0xef   :  { %v929_v48 = vmul.f32 %v925_v9, %v877_v44  ;;  %v931_v36 = vadd.f32 %v927_v20, %v818_v11 }
  0xf0   :  { %v930_v37 = vmul.f32 %v926_v5, %v878_v60  ;;  %v932_v42 = vadd.f32 %v928_v16, %v819_v23 }
  0xf1   :  { %v933_v49 = vadd.f32 %v929_v48, %v820_v32  ;;  %935 = vst [vmem:[#allocation7] sm:$0xff] %v931_v36 }
  0xf2   :  { %v934_v6 = vadd.f32 %v930_v37, %v821_v34  ;;  %936 = vst [vmem:[#allocation7 + $0x8] sm:$0xff] %v932_v42 }
  0xf3   :  { %937 = vst [vmem:[#allocation7 + $0x10] sm:$0xff] %v933_v49 }
  0xf4   :  { %938 = vst [vmem:[#allocation7 + $0x18] sm:$0xff] %v934_v6 }
  0xf5   :  { %1221 = shalt.err (!%p1218_p6)
}
  0xf6   :  { %s1222_s10 = scalar_lea.hbm %s2223_s2, 512 }
  0xf7   :  { %p1223_p7 = scmp.ne.s32.totalorder %s2223_s2, %s1222_s10  ;;  %p1226_p8 = scmp.lt.u32.totalorder %s1222_s10, %s2223_s2 }
  0xf9   :  { %p1228_p9 = pnand %p1226_p8, %p1223_p7 }
  0xfb   :  { %1231 = shalt.err (!%p1228_p9)
}
  0xfc   :  { %948 = dma.vmem_to_hbm [thread:$0]  %s946_s6, 512, %s2223_s2, [#allocation4]  }
  0xfd   :  { %1236 = dma.done.wait [#allocation4], 512  }
  0xfe   :  { %1237 = vsyncadd [#allocation4], 4294966784 }
  0xff   :  { %952 = vsyncpa [#allocation3], 1 }
 0x100   :  { %953 = vsyncpa [#allocation6], 1 }
 0x101   :  { %954 = vsyncpa [#allocation4], 1 }

</bundles_post_ra>
